<compile_context>
chip_gen: v5e
topology: v5e:2x2
jax: 0.10.0
libtpu: 0.0.40
codegen_flags: <defaults>
</compile_context>

<pallas_src>
import functools

import jax
import jax.numpy as jnp
from jax import lax
from jax.experimental import pallas as pl
from jax.experimental.pallas import tpu as pltpu


def _pair_dist(xi, xjt, sqi, sqj):
    """Tile of pairwise distances: sqrt(relu(||xi||^2 + ||xj||^2 - 2 xi.xj))."""
    prec = lax.Precision.HIGHEST if xi.dtype == jnp.float32 else None
    sim = jnp.dot(xi, xjt, precision=prec,
                  preferred_element_type=jnp.float32)            # (tile, tile) f32
    d2 = sqi + sqj - 2.0 * sim                                   # f32 norms
    return jnp.sqrt(jnp.maximum(d2, 0.0))


def _row_chunks_sum(x, tile):
    """(tile, tile) -> (tile, 128) via lane-aligned 128-wide chunks (VPU adds only)."""
    part = x[:, 0:128]
    for k in range(1, tile // 128):
        part = part + x[:, k * 128:(k + 1) * 128]
    return part


def _neg_sums_kernel(bi_ref, bj_ref,
                     xi_ref, xjt_ref, sqi_ref, sqj_ref, ti_ref, tj_ref,
                     row_out_ref, col_out_ref, acc_ref,
                     *, margin, n_valid, num_blocks, exp_dtype):
    """Pass 1: per-row sum_k exp(margin - d(r,k)) over negatives (symmetric)."""
    s = pl.program_id(0)
    bi = bi_ref[s]
    bj = bj_ref[s]
    tile = acc_ref.shape[0]

    # Upper-tri ordering: the first column-block for row-block bi is bj == bi.
    @pl.when(bj == bi)
    def _init_acc():
        acc_ref[...] = jnp.zeros_like(acc_ref)

    dist = _pair_dist(xi_ref[...], xjt_ref[...], sqi_ref[...], sqj_ref[...])

    r = bi * tile + lax.broadcasted_iota(jnp.int32, (tile, 1), 0)   # global rows
    c = bj * tile + lax.broadcasted_iota(jnp.int32, (1, tile), 1)   # global cols
    valid = jnp.logical_and(r < n_valid, c < n_valid)               # drop padded rows/cols

    # Negatives: different label AND nonzero distance (mirrors neg_dist.nonzero()).
    neg = jnp.logical_and(ti_ref[...] != tj_ref[...], dist != 0.0)
    neg = jnp.logical_and(neg, valid)
    e = jnp.exp((margin - dist).astype(exp_dtype)).astype(jnp.float32)
    neg_exp = jnp.where(neg, e, 0.0)

    # Row-sum partials for block bi: lane-dense (tile, 128) accumulate; the
    # cross-lane reduce happens only once per row-block (flush below).
    acc_ref[...] += _row_chunks_sum(neg_exp, tile)

    # Mirrored contribution to the rows of block bj: column sums of this tile
    # equal the row sums of the never-visited mirror tile (bj, bi).  Diagonal
    # tiles would double-count, so emit zeros for them; the wrapper
    # scatter-adds these per-step rows by bj.
    cs = jnp.sum(neg_exp, axis=0, keepdims=True)                    # (1, tile)
    col_out_ref[...] = jnp.where(bi == bj, 0.0, cs)[None]           # (1, 1, tile)

    # Last column-block of this row-block: flush the per-row sums.
    @pl.when(bj == num_blocks - 1)
    def _flush():
        row_out_ref[...] = jnp.sum(acc_ref[...], axis=1, keepdims=True)


def _loss_rows_kernel(bi_ref, bj_ref, flag_ref,
                      xi_ref, xjt_ref, sqi_ref, sqj_ref, ti_ref, tj_ref,
                      negi_ref, negj_ref,
                      out_ref, acc_ref,
                      *, n_valid, num_blocks):
    """Pass 2: per-row sum of relu(J_ij)^2 over upper-tri positive pairs."""
    s = pl.program_id(0)
    bi = bi_ref[s]
    bj = bj_ref[s]
    tile = acc_ref.shape[0]

    @pl.when(bj == bi)
    def _init_acc():
        acc_ref[...] = jnp.zeros_like(acc_ref)

    # Tile pairs with no (upper-triangle) positive pair contribute exactly 0:
    # skip all compute (DMA/grid overhead still paid, but no MXU/EUP/VPU work).
    @pl.when(flag_ref[s] != 0)
    def _compute():
        dist = _pair_dist(xi_ref[...], xjt_ref[...], sqi_ref[...], sqj_ref[...])
        r = bi * tile + lax.broadcasted_iota(jnp.int32, (tile, 1), 0)
        c = bj * tile + lax.broadcasted_iota(jnp.int32, (1, tile), 1)
        # Upper-triangle positives; c < n_valid drops padded columns and, with
        # r < c, also implies r < n_valid.
        sel = jnp.logical_and(ti_ref[...] == tj_ref[...], r < c)
        sel = jnp.logical_and(sel, c < n_valid)
        # log(0) -> -inf is clamped by the relu below (matches the reference).
        jij = jnp.log(negi_ref[...] + negj_ref[...]) + dist
        hinge2 = jnp.square(jnp.maximum(jij, 0.0))
        acc_ref[...] += _row_chunks_sum(jnp.where(sel, hinge2, 0.0), tile)

    @pl.when(bj == num_blocks - 1)
    def _flush():
        out_ref[...] = jnp.sum(acc_ref[...], axis=1, keepdims=True)


def _choose_tile(n, max_tile):
    """Pick a power-of-two tile (>=128) and the padded batch size it implies."""
    best = None
    t = 128
    while t <= max(128, max_tile):
        n_pad = ((n + t - 1) // t) * t
        nb = n_pad // t
        steps = nb * (nb + 1) // 2
        # Element work of the upper-tri tiles + a per-grid-step overhead proxy.
        cost = steps * (t * t + 64 * 1024)
        if best is None or cost < best[0]:
            best = (cost, t, n_pad)
        t *= 2
    return best[1], best[2]


def lifted_structure_loss(inputs, targets, *, margin=1.0, max_tile=512,
                          matmul_dtype=jnp.bfloat16, exp_dtype=jnp.float32,
                          vmem_limit_bytes=None):
    """Pallas TPU implementation of LiftedStructureLoss.forward.

    max_tile=512 is safe on every TPU generation (fits v7x's 64 MiB VMEM with
    headroom); 1024 is worthwhile on v5e/v6e.  exp_dtype=jnp.bfloat16 uses the
    faster bf16 EUP path for the pass-1 exp on v6e/v7x (do NOT use on v5e).
    """
    n, d = inputs.shape
    tile, n_pad = _choose_tile(n, max_tile)
    nb = n_pad // tile
    pad = n_pad - n

    x_f32 = inputs.astype(jnp.float32)
    t0 = targets.astype(jnp.int32)
    # Number of positive pairs excluding the diagonal (reference's len_p).
    len_p = jnp.sum((t0[:, None] == t0[None, :]).astype(jnp.float32)) - n

    if pad:
        x_f32 = jnp.pad(x_f32, ((0, pad), (0, 0)))
        t_pad = jnp.pad(t0, (0, pad), constant_values=-1)    # sentinel label
    else:
        t_pad = t0

    sq = jnp.sum(x_f32 * x_f32, axis=1)                      # (n_pad,) f32 squared norms
    sq_col, sq_row = sq.reshape(n_pad, 1), sq.reshape(1, n_pad)
    t_col, t_row = t_pad.reshape(n_pad, 1), t_pad.reshape(1, n_pad)

    x = x_f32.astype(matmul_dtype)                           # MXU operand (bf16 default)
    xt = jnp.transpose(x)                                    # (d, n_pad): one-time transpose

    # Upper-triangular tile-pair enumeration (scalar-prefetched block indices).
    pairs = [(i, j) for i in range(nb) for j in range(i, nb)]
    num_steps = len(pairs)
    bi_idx = jnp.asarray([p[0] for p in pairs], dtype=jnp.int32)
    bj_idx = jnp.asarray([p[1] for p in pairs], dtype=jnp.int32)

    if vmem_limit_bytes is None:
        itemsize = jnp.dtype(matmul_dtype).itemsize
        io = 2 * 2 * tile * d * itemsize                     # double-buffered x / x^T tiles
        temps = 8 * tile * tile * 4                          # dist/exp/mask/hinge f32 temporaries
        scratch = tile * 128 * 4 + 4 * tile * 4
        vmem_limit_bytes = int(min(100 * 2 ** 20,
                                   max(32 * 2 ** 20, (io + temps + scratch) * 3 // 2)))
    cparams = pltpu.CompilerParams(
        dimension_semantics=("arbitrary",),                  # flattened upper-tri grid
        vmem_limit_bytes=vmem_limit_bytes)

    # Pass-1 BlockSpecs (index maps receive the 2 scalar-prefetch refs).
    row_x = pl.BlockSpec((tile, d), lambda s, bi, bj: (bi[s], 0))
    col_xt = pl.BlockSpec((d, tile), lambda s, bi, bj: (0, bj[s]))
    col_vec = pl.BlockSpec((tile, 1), lambda s, bi, bj: (bi[s], 0))
    row_vec = pl.BlockSpec((1, tile), lambda s, bi, bj: (0, bj[s]))

    # ---- Pass 1: per-row negative exp-sums, exploiting dist symmetry --------
    neg_row_part, neg_col_rows = pl.pallas_call(
        functools.partial(_neg_sums_kernel, margin=float(margin), n_valid=n,
                          num_blocks=nb, exp_dtype=exp_dtype),
        out_shape=(jax.ShapeDtypeStruct((n_pad, 1), jnp.float32),
                   jax.ShapeDtypeStruct((num_steps, 1, tile), jnp.float32)),
        grid_spec=pltpu.PrefetchScalarGridSpec(
            num_scalar_prefetch=2,
            grid=(num_steps,),
            in_specs=[row_x, col_xt, col_vec, row_vec, col_vec, row_vec],
            out_specs=[pl.BlockSpec((tile, 1), lambda s, bi, bj: (bi[s], 0)),
                       pl.BlockSpec((1, 1, tile), lambda s, bi, bj: (s, 0, 0))],
            scratch_shapes=[pltpu.VMEM((tile, 128), jnp.float32)]),
        compiler_params=cparams,
    )(bi_idx, bj_idx, x, xt, sq_col, sq_row, t_col, t_row)

    # Tiny XLA-side combine: scatter-add the mirrored per-step column-sum rows
    # into their row blocks (bj) and add the in-kernel row-sum part.
    col_blocks = jnp.zeros((nb, tile), jnp.float32).at[bj_idx].add(
        neg_col_rows.reshape(num_steps, tile))
    neg_sum = neg_row_part[:, 0] + col_blocks.reshape(n_pad)
    neg_colvec = neg_sum.reshape(n_pad, 1)
    neg_rowvec = neg_sum.reshape(1, n_pad)

    # Per-tile-pair "contains an upper-tri positive pair" flags (exact skip).
    # TODO(synk): replace the O(N^2) boolean pair matrix with per-block
    #             label-set intersection if batch sizes ever get huge.
    idx = jnp.arange(n_pad)
    pos_pair = jnp.logical_and(t_pad[:, None] == t_pad[None, :],
                               idx[:, None] < idx[None, :])
    pos_pair = jnp.logical_and(pos_pair, idx[None, :] < n)
    block_pos = pos_pair.reshape(nb, tile, nb, tile).any(axis=(1, 3))
    flags = block_pos[bi_idx, bj_idx].astype(jnp.int32)

    # Pass-2 BlockSpecs (index maps receive the 3 scalar-prefetch refs).
    row_x2 = pl.BlockSpec((tile, d), lambda s, bi, bj, fl: (bi[s], 0))
    col_xt2 = pl.BlockSpec((d, tile), lambda s, bi, bj, fl: (0, bj[s]))
    col_vec2 = pl.BlockSpec((tile, 1), lambda s, bi, bj, fl: (bi[s], 0))
    row_vec2 = pl.BlockSpec((1, tile), lambda s, bi, bj, fl: (0, bj[s]))

    # ---- Pass 2: sums of relu(J)^2 over upper-triangle positive pairs -------
    row_loss = pl.pallas_call(
        functools.partial(_loss_rows_kernel, n_valid=n, num_blocks=nb),
        out_shape=jax.ShapeDtypeStruct((n_pad, 1), jnp.float32),
        grid_spec=pltpu.PrefetchScalarGridSpec(
            num_scalar_prefetch=3,
            grid=(num_steps,),
            in_specs=[row_x2, col_xt2, col_vec2, row_vec2, col_vec2, row_vec2,
                      col_vec2, row_vec2],
            out_specs=pl.BlockSpec((tile, 1), lambda s, bi, bj, fl: (bi[s], 0)),
            scratch_shapes=[pltpu.VMEM((tile, 128), jnp.float32)]),
        compiler_params=cparams,
    )(bi_idx, bj_idx, flags, x, xt, sq_col, sq_row, t_col, t_row,
      neg_colvec, neg_rowvec)

    # NOTE: like the reference, the result is NaN if there are no positive pairs.
    return jnp.sum(row_loss) / len_p


def _reference_loss(inputs, targets, *, margin=1.0):
    """Pure-JAX mirror of the PyTorch forward (sanity check, full f32)."""
    n = inputs.shape[0]
    x = inputs.astype(jnp.float32)
    sq = jnp.sum(x * x, axis=1)
    sim = jnp.dot(x, x.T, precision=lax.Precision.HIGHEST)
    d2 = sq[None, :] + sq[:, None] - 2.0 * sim
    dist = jnp.sqrt(jnp.maximum(d2, 0.0))
    eye = jnp.eye(n, dtype=bool)
    pos_full = targets[:, None] == targets[None, :]
    pos_mask = pos_full & ~eye
    neg_mask = ~pos_full
    neg_dist = jnp.where(neg_mask, dist, 0.0)
    row_neg = jnp.sum(jnp.where(neg_dist != 0.0, jnp.exp(margin - neg_dist), 0.0),
                      axis=1)
    J = jnp.log(row_neg[:, None] + row_neg[None, :]) + jnp.where(pos_mask, dist, 0.0)
    upper_pos = jnp.triu(pos_mask, k=1)
    loss = jnp.sum(jnp.where(upper_pos, jnp.maximum(J, 0.0) ** 2, 0.0))
    return loss / jnp.sum(pos_mask)


if __name__ == "__main__":
    key_a, key_b = jax.random.split(jax.random.PRNGKey(0))

    # Primary small example: 8 embeddings of dim 32, 4 classes x 2.
    n, d = 8, 32
    inputs = jax.random.normal(key_a, (n, d), dtype=jnp.float32)
    targets = jnp.array([0, 0, 1, 1, 2, 2, 3, 3], dtype=jnp.int32)
    ref = _reference_loss(inputs, targets, margin=1.0)

    # Exact-f32 MXU path: tight check against the f32 reference.
    loss_f32 = jax.block_until_ready(
        lifted_structure_loss(inputs, targets, margin=1.0,
                              matmul_dtype=jnp.float32))
    assert jnp.isfinite(loss_f32), "f32 kernel produced non-finite loss"
    assert abs(float(loss_f32) - float(ref)) <= 5e-3 * max(1.0, abs(float(ref))), (
        float(loss_f32), float(ref))

    # Default bf16-MXU path: looser check (bf16 rounding of the similarity matmul).
    loss_bf16 = jax.block_until_ready(
        lifted_structure_loss(inputs, targets, margin=1.0))
    assert jnp.isfinite(loss_bf16), "bf16 kernel produced non-finite loss"
    assert abs(float(loss_bf16) - float(ref)) <= 5e-2 * max(1.0, abs(float(ref))), (
        float(loss_bf16), float(ref))

    # Secondary check exercising multi-block tiling, padding, the mirrored
    # column-sum path and the positive-tile flags (nb=2 forced via max_tile=128).
    n2, d2 = 192, 16
    inputs2 = jax.random.normal(key_b, (n2, d2), dtype=jnp.float32)
    targets2 = jnp.arange(n2, dtype=jnp.int32) % 24
    ref2 = _reference_loss(inputs2, targets2, margin=1.0)
    loss2 = jax.block_until_ready(
        lifted_structure_loss(inputs2, targets2, margin=1.0,
                              matmul_dtype=jnp.float32, max_tile=128))
    assert jnp.isfinite(loss2), "multi-block kernel produced non-finite loss"
    assert abs(float(loss2) - float(ref2)) <= 5e-3 * max(1.0, abs(float(ref2))), (
        float(loss2), float(ref2))

    print("KERNEL_OK")
</pallas_src>

<mosaic_0001>
module attributes {stable_mosaic.version = 11 : i64} {
  func.func @_neg_sums_kernel(%arg0: i32, %arg1: memref<1xi32, #tpu.memory_space<smem>>, %arg2: memref<1xi32, #tpu.memory_space<smem>>, %arg3: memref<128x32xf32, #tpu.memory_space<vmem>>, %arg4: memref<32x128xf32, #tpu.memory_space<vmem>>, %arg5: memref<128x1xf32, #tpu.memory_space<vmem>>, %arg6: memref<1x128xf32, #tpu.memory_space<vmem>>, %arg7: memref<128x1xi32, #tpu.memory_space<vmem>>, %arg8: memref<1x128xi32, #tpu.memory_space<vmem>>, %arg9: memref<128x1xf32, #tpu.memory_space<vmem>>, %arg10: memref<1x1x128xf32, #tpu.memory_space<vmem>>, %arg11: memref<128x128xf32, #tpu.memory_space<vmem>>) attributes {dimension_semantics = [#tpu.dimension_semantics<arbitrary>], iteration_bounds = array<i64: 1>, scalar_prefetch = 2 : i64, scratch_operands = 1 : i64, tpu.core_type = #tpu.core_type<tc>, window_params = [{transform_indices = @transform_0, window_bounds = array<i64: 128, 32>}, {transform_indices = @transform_1, window_bounds = array<i64: 32, 128>}, {transform_indices = @transform_2, window_bounds = array<i64: 128, 1>}, {transform_indices = @transform_3, window_bounds = array<i64: 1, 128>}, {transform_indices = @transform_4, window_bounds = array<i64: 128, 1>}, {transform_indices = @transform_5, window_bounds = array<i64: 1, 128>}, {transform_indices = @transform_6, window_bounds = array<i64: 128, 1>}, {transform_indices = @transform_7, window_bounds = array<i64: 1, 1, 128>}]} {
    %0 = arith.index_cast %arg0 : i32 to index
    %1 = memref.load %arg1[%0] : memref<1xi32, #tpu.memory_space<smem>>
    %2 = arith.index_cast %arg0 : i32 to index
    %3 = memref.load %arg2[%2] : memref<1xi32, #tpu.memory_space<smem>>
    %4 = arith.cmpi eq, %3, %1 : i32
    %5 = arith.extui %4 : i1 to i32
    %c0_i32 = arith.constant 0 : i32
    %6 = arith.cmpi ne, %5, %c0_i32 : i32
    scf.if %6 {
      %cst_29 = arith.constant 0.000000e+00 : f32
      %63 = vector.broadcast %cst_29 : f32 to vector<128x128xf32>
      %c0_30 = arith.constant 0 : index
      %c0_31 = arith.constant 0 : index
      %64 = vector.load %arg11[%c0_30, %c0_31] : memref<128x128xf32, #tpu.memory_space<vmem>>, vector<128x128xf32>
      tpu.vector_store %arg11[%c0_30, %c0_31], %63 {strides = array<i32>} : memref<128x128xf32, #tpu.memory_space<vmem>>, vector<128x128xf32>,
    } else {
    }
    %c0 = arith.constant 0 : index
    %c0_0 = arith.constant 0 : index
    %7 = vector.load %arg3[%c0, %c0_0] : memref<128x32xf32, #tpu.memory_space<vmem>>, vector<128x32xf32>
    %c0_1 = arith.constant 0 : index
    %c0_2 = arith.constant 0 : index
    %8 = vector.load %arg4[%c0_1, %c0_2] : memref<32x128xf32, #tpu.memory_space<vmem>>, vector<32x128xf32>
    %c0_3 = arith.constant 0 : index
    %c0_4 = arith.constant 0 : index
    %9 = vector.load %arg5[%c0_3, %c0_4] : memref<128x1xf32, #tpu.memory_space<vmem>>, vector<128x1xf32>
    %c0_5 = arith.constant 0 : index
    %c0_6 = arith.constant 0 : index
    %10 = vector.load %arg6[%c0_5, %c0_6] : memref<1x128xf32, #tpu.memory_space<vmem>>, vector<1x128xf32>
    %cst = arith.constant dense<0.000000e+00> : vector<128x128xf32>
    %11 = tpu.matmul %7, %8, %cst {dimension_numbers = #tpu.dot_dimension_numbers<[1], [0], [0], [1], [0, 0, 1, 1], [], []>, precision = #tpu.contract_precision<fp32>} : vector<128x32xf32>, vector<32x128xf32>, vector<128x128xf32> -> vector<128x128xf32>
    %12 = vector.broadcast %9 : vector<128x1xf32> to vector<128x128xf32>
    %13 = vector.broadcast %10 : vector<1x128xf32> to vector<128x128xf32>
    %14 = arith.addf %12, %13 : vector<128x128xf32>
    %cst_7 = arith.constant 2.000000e+00 : f32
    %15 = vector.broadcast %cst_7 : f32 to vector<128x128xf32>
    %16 = arith.mulf %15, %11 : vector<128x128xf32>
    %17 = arith.subf %14, %16 : vector<128x128xf32>
    %cst_8 = arith.constant 0.000000e+00 : f32
    %18 = vector.broadcast %cst_8 : f32 to vector<128x128xf32>
    %19 = arith.maximumf %17, %18 : vector<128x128xf32>
    %20 = math.sqrt %19 : vector<128x128xf32>
    %c128_i32 = arith.constant 128 : i32
    %21 = arith.muli %1, %c128_i32 : i32
    %22 = tpu.iota {dimensions = array<i32: 0>} : vector<128x1xi32>
    %23 = vector.broadcast %21 : i32 to vector<128x1xi32>
    %24 = arith.addi %23, %22 : vector<128x1xi32>
    %c128_i32_9 = arith.constant 128 : i32
    %25 = arith.muli %3, %c128_i32_9 : i32
    %26 = tpu.iota {dimensions = array<i32: 1>} : vector<1x128xi32>
    %27 = vector.broadcast %25 : i32 to vector<1x128xi32>
    %28 = arith.addi %27, %26 : vector<1x128xi32>
    %c8_i32 = arith.constant 8 : i32
    %29 = vector.broadcast %c8_i32 : i32 to vector<128x1xi32>
    %30 = arith.cmpi slt, %24, %29 : vector<128x1xi32>
    %c8_i32_10 = arith.constant 8 : i32
    %31 = vector.broadcast %c8_i32_10 : i32 to vector<1x128xi32>
    %32 = arith.cmpi slt, %28, %31 : vector<1x128xi32>
    %33 = vector.broadcast %30 : vector<128x1xi1> to vector<128x128xi1>
    %34 = vector.broadcast %32 : vector<1x128xi1> to vector<128x128xi1>
    %35 = arith.andi %33, %34 : vector<128x128xi1>
    %c0_11 = arith.constant 0 : index
    %c0_12 = arith.constant 0 : index
    %36 = vector.load %arg7[%c0_11, %c0_12] : memref<128x1xi32, #tpu.memory_space<vmem>>, vector<128x1xi32>
    %c0_13 = arith.constant 0 : index
    %c0_14 = arith.constant 0 : index
    %37 = vector.load %arg8[%c0_13, %c0_14] : memref<1x128xi32, #tpu.memory_space<vmem>>, vector<1x128xi32>
    %38 = vector.broadcast %36 : vector<128x1xi32> to vector<128x128xi32>
    %39 = vector.broadcast %37 : vector<1x128xi32> to vector<128x128xi32>
    %40 = arith.cmpi ne, %38, %39 : vector<128x128xi32>
    %cst_15 = arith.constant 0.000000e+00 : f32
    %41 = vector.broadcast %cst_15 : f32 to vector<128x128xf32>
    %42 = arith.cmpf one, %20, %41 : vector<128x128xf32>
    %43 = arith.andi %40, %42 : vector<128x128xi1>
    %44 = arith.andi %43, %35 : vector<128x128xi1>
    %cst_16 = arith.constant 1.000000e+00 : f32
    %45 = vector.broadcast %cst_16 : f32 to vector<128x128xf32>
    %46 = arith.subf %45, %20 : vector<128x128xf32>
    %47 = math.exp %46 : vector<128x128xf32>
    %cst_17 = arith.constant 0.000000e+00 : f32
    %48 = vector.broadcast %cst_17 : f32 to vector<128x128xf32>
    %49 = arith.select %44, %47, %48 : vector<128x128xi1>, vector<128x128xf32>
    %c0_18 = arith.constant 0 : index
    %c0_19 = arith.constant 0 : index
    %50 = vector.load %arg11[%c0_18, %c0_19] : memref<128x128xf32, #tpu.memory_space<vmem>>, vector<128x128xf32>
    %51 = arith.addf %50, %49 : vector<128x128xf32>
    %c0_20 = arith.constant 0 : index
    %c0_21 = arith.constant 0 : index
    %52 = vector.load %arg11[%c0_20, %c0_21] : memref<128x128xf32, #tpu.memory_space<vmem>>, vector<128x128xf32>
    tpu.vector_store %arg11[%c0_20, %c0_21], %51 {strides = array<i32>} : memref<128x128xf32, #tpu.memory_space<vmem>>, vector<128x128xf32>,
    %cst_22 = arith.constant dense<0.000000e+00> : vector<128xf32>
    %53 = vector.multi_reduction <add>, %49, %cst_22 [0] : vector<128x128xf32> to vector<128xf32>
    %54 = vector.shape_cast %53 : vector<128xf32> to vector<1x128xf32>
    %55 = arith.cmpi eq, %1, %3 : i32
    %cst_23 = arith.constant 0.000000e+00 : f32
    %56 = vector.broadcast %cst_23 : f32 to vector<1x128xf32>
    %57 = arith.select %55, %56, %54 : vector<1x128xf32>
    %58 = vector.shape_cast %57 : vector<1x128xf32> to vector<1x1x128xf32>
    %c0_24 = arith.constant 0 : index
    %c0_25 = arith.constant 0 : index
    %c0_26 = arith.constant 0 : index
    %59 = vector.load %arg10[%c0_24, %c0_25, %c0_26] : memref<1x1x128xf32, #tpu.memory_space<vmem>>, vector<1x1x128xf32>
    tpu.vector_store %arg10[%c0_24, %c0_25, %c0_26], %58 {strides = array<i32>} : memref<1x1x128xf32, #tpu.memory_space<vmem>>, vector<1x1x128xf32>,
    %c0_i32_27 = arith.constant 0 : i32
    %60 = arith.cmpi eq, %3, %c0_i32_27 : i32
    %61 = arith.extui %60 : i1 to i32
    %c0_i32_28 = arith.constant 0 : i32
    %62 = arith.cmpi ne, %61, %c0_i32_28 : i32
    scf.if %62 {
      %c0_29 = arith.constant 0 : index
      %c0_30 = arith.constant 0 : index
      %63 = vector.load %arg11[%c0_29, %c0_30] : memref<128x128xf32, #tpu.memory_space<vmem>>, vector<128x128xf32>
      %cst_31 = arith.constant dense<0.000000e+00> : vector<128xf32>
      %64 = vector.multi_reduction <add>, %63, %cst_31 [1] : vector<128x128xf32> to vector<128xf32>
      %65 = vector.shape_cast %64 : vector<128xf32> to vector<128x1xf32>
      %c0_32 = arith.constant 0 : index
      %c0_33 = arith.constant 0 : index
      %66 = vector.load %arg9[%c0_32, %c0_33] : memref<128x1xf32, #tpu.memory_space<vmem>>, vector<128x1xf32>
      tpu.vector_store %arg9[%c0_32, %c0_33], %65 {strides = array<i32>} : memref<128x1xf32, #tpu.memory_space<vmem>>, vector<128x1xf32>,
    } else {
    }
    return
  }
  func.func @transform_0(%arg0: i32, %arg1: memref<1xi32, #tpu.memory_space<smem>>, %arg2: memref<1xi32, #tpu.memory_space<smem>>) -> (i32, i32) {
    %0 = arith.index_cast %arg0 : i32 to index
    %1 = memref.load %arg1[%0] : memref<1xi32, #tpu.memory_space<smem>>
    %c0_i32 = arith.constant 0 : i32
    %c0_i32_0 = arith.constant 0 : i32
    return %1, %c0_i32 : i32, i32
  }
  func.func @transform_1(%arg0: i32, %arg1: memref<1xi32, #tpu.memory_space<smem>>, %arg2: memref<1xi32, #tpu.memory_space<smem>>) -> (i32, i32) {
    %0 = arith.index_cast %arg0 : i32 to index
    %1 = memref.load %arg2[%0] : memref<1xi32, #tpu.memory_space<smem>>
    %c0_i32 = arith.constant 0 : i32
    %c0_i32_0 = arith.constant 0 : i32
    return %c0_i32, %1 : i32, i32
  }
  func.func @transform_2(%arg0: i32, %arg1: memref<1xi32, #tpu.memory_space<smem>>, %arg2: memref<1xi32, #tpu.memory_space<smem>>) -> (i32, i32) {
    %0 = arith.index_cast %arg0 : i32 to index
    %1 = memref.load %arg1[%0] : memref<1xi32, #tpu.memory_space<smem>>
    %c0_i32 = arith.constant 0 : i32
    %c0_i32_0 = arith.constant 0 : i32
    return %1, %c0_i32 : i32, i32
  }
  func.func @transform_3(%arg0: i32, %arg1: memref<1xi32, #tpu.memory_space<smem>>, %arg2: memref<1xi32, #tpu.memory_space<smem>>) -> (i32, i32) {
    %0 = arith.index_cast %arg0 : i32 to index
    %1 = memref.load %arg2[%0] : memref<1xi32, #tpu.memory_space<smem>>
    %c0_i32 = arith.constant 0 : i32
    %c0_i32_0 = arith.constant 0 : i32
    return %c0_i32, %1 : i32, i32
  }
  func.func @transform_4(%arg0: i32, %arg1: memref<1xi32, #tpu.memory_space<smem>>, %arg2: memref<1xi32, #tpu.memory_space<smem>>) -> (i32, i32) {
    %0 = arith.index_cast %arg0 : i32 to index
    %1 = memref.load %arg1[%0] : memref<1xi32, #tpu.memory_space<smem>>
    %c0_i32 = arith.constant 0 : i32
    %c0_i32_0 = arith.constant 0 : i32
    return %1, %c0_i32 : i32, i32
  }
  func.func @transform_5(%arg0: i32, %arg1: memref<1xi32, #tpu.memory_space<smem>>, %arg2: memref<1xi32, #tpu.memory_space<smem>>) -> (i32, i32) {
    %0 = arith.index_cast %arg0 : i32 to index
    %1 = memref.load %arg2[%0] : memref<1xi32, #tpu.memory_space<smem>>
    %c0_i32 = arith.constant 0 : i32
    %c0_i32_0 = arith.constant 0 : i32
    return %c0_i32, %1 : i32, i32
  }
  func.func @transform_6(%arg0: i32, %arg1: memref<1xi32, #tpu.memory_space<smem>>, %arg2: memref<1xi32, #tpu.memory_space<smem>>) -> (i32, i32) {
    %0 = arith.index_cast %arg0 : i32 to index
    %1 = memref.load %arg1[%0] : memref<1xi32, #tpu.memory_space<smem>>
    %c0_i32 = arith.constant 0 : i32
    %c0_i32_0 = arith.constant 0 : i32
    return %1, %c0_i32 : i32, i32
  }
  func.func @transform_7(%arg0: i32, %arg1: memref<1xi32, #tpu.memory_space<smem>>, %arg2: memref<1xi32, #tpu.memory_space<smem>>) -> (i32, i32, i32) {
    %c0_i32 = arith.constant 0 : i32
    %c0_i32_0 = arith.constant 0 : i32
    %c0_i32_1 = arith.constant 0 : i32
    return %arg0, %c0_i32, %c0_i32_0 : i32, i32, i32
  }
}

</mosaic_0001>

<bundles_post_ra>
// kernel: tpu_custom_call.1
= control target key start
LH: loop header
LB: loop body
LE: loop exit
PB: predicated region body
PF: predicated region fallthrough
CT: control target
= control target key end

     0   :  { %17 = vsyncpa [#allocation7], 0  ;;  %s2997_s0 = inlined_call_operand.<no memory space> [shape: s32[1], index: 0, kind: input, shape index: {}]   ;;  %s2998_s1 = inlined_call_operand.<no memory space> [shape: s32[1], index: 1, kind: input, shape index: {}]   ;;  %s2999_s2 = inlined_call_operand.vmem [shape: f32[128,32], index: 2, kind: input, shape index: {}]   ;;  %s3000_s3 = inlined_call_operand.vmem [shape: f32[32,128], index: 3, kind: input, shape index: {}]   ;;  %s3001_s4 = inlined_call_operand.vmem [shape: f32[128,1], index: 4, kind: input, shape index: {}]   ;;  %s3002_s5 = inlined_call_operand.vmem [shape: f32[1,128], index: 5, kind: input, shape index: {}]   ;;  %s3003_s6 = inlined_call_operand.vmem [shape: s32[128,1], index: 6, kind: input, shape index: {}]   ;;  %s3004_s7 = inlined_call_operand.vmem [shape: s32[1,128], index: 7, kind: input, shape index: {}]   ;;  %s3005_s8 = inlined_call_operand.vmem [shape: f32[128,1], index: 8, kind: output, shape index: {0}]   ;;  %s3006_s9 = inlined_call_operand.hbm [shape: f32[1,1,128], index: 9, kind: output, shape index: {1}]  }
   0x1   :  { %s1769_s11 = sshll.u32 %s2997_s0, 4  ;;  %p116_p0 = scmp.lt.s32.totalorder %s2998_s1, 0 }
   0x2   :  { %p109_p1 = scmp.lt.s32.totalorder %s1769_s11, 15  ;;  %p1778_p2 = scmp.ne.s32.totalorder %s2998_s1, %s2997_s0 }
   0x3   :  { %s1951_s16 = scalar_select %p116_p0, %s2998_s1, 0 }
   0x4   :  { %s3064_s11 = smov (!%p109_p1, %s1769_s11), 15 }
   0x5   :  { %s1771_s17 = sshll.u32 %s1951_s16, 3  ;;  %s132_s20 = scalar_lea.vmem %s3002_s5, %s1951_s16 }
   0x6   :  { %s1770_s21 = sshll.u32 %s3064_s11, 3  ;;  %s1961_s24 = scalar_lea.vmem %s3000_s3, %s1771_s17 }
   0x7   :  { %s1966_s27 = scalar_lea.vmem %s2999_s2, %s1770_s21  ;;  %s1971_s30 = scalar_lea.vmem %s3001_s4, %s1770_s21 }
   0x8   :  { %s1976_s13 = scalar_lea.vmem %s3003_s6, %s1770_s21  ;;  %s1982_s3 = scalar_lea.vmem %s3004_s7, %s1951_s16 }
   0x9   :  { %s1987_s2 = scalar_lea.vmem %s3005_s8, %s1770_s21  ;;  %160 = sbr.rel (%p1778_p2) target bundleno = 31 (0x1f), region = 29 }
   0xe   :  { %v1889_v0 = vmov 0.0  }
   0xf   :  { %161 = vst [vmem:[#allocation2 + $0x30] sm:$0xff] %v1889_v0 }
  0x10   :  { %162 = vst [vmem:[#allocation2] sm:$0xff] %v1889_v0 }
  0x11   :  { %163 = vst [vmem:[#allocation2 + $0x58] sm:$0xff] %v1889_v0 }
  0x12   :  { %164 = vst [vmem:[#allocation2 + $0x18] sm:$0xff] %v1889_v0 }
  0x13   :  { %165 = vst [vmem:[#allocation2 + $0x50] sm:$0xff] %v1889_v0 }
  0x14   :  { %166 = vst [vmem:[#allocation2 + $0x68] sm:$0xff] %v1889_v0 }
  0x15   :  { %167 = vst [vmem:[#allocation2 + $0x8] sm:$0xff] %v1889_v0 }
  0x16   :  { %168 = vst [vmem:[#allocation2 + $0x48] sm:$0xff] %v1889_v0 }
  0x17   :  { %169 = vst [vmem:[#allocation2 + $0x40] sm:$0xff] %v1889_v0 }
  0x18   :  { %170 = vst [vmem:[#allocation2 + $0x20] sm:$0xff] %v1889_v0 }
  0x19   :  { %171 = vst [vmem:[#allocation2 + $0x10] sm:$0xff] %v1889_v0 }
  0x1a   :  { %172 = vst [vmem:[#allocation2 + $0x38] sm:$0xff] %v1889_v0 }
  0x1b   :  { %173 = vst [vmem:[#allocation2 + $0x60] sm:$0xff] %v1889_v0 }
  0x1c   :  { %174 = vst [vmem:[#allocation2 + $0x70] sm:$0xff] %v1889_v0 }
  0x1d   :  { %175 = vst [vmem:[#allocation2 + $0x78] sm:$0xff] %v1889_v0 }
  0x1e   :  { %176 = vst [vmem:[#allocation2 + $0x28] sm:$0xff] %v1889_v0 }
  0x1f PF:  { %v196_v1 = vld [vmem:[%s1961_s24 + $0x18] sm:$0xff]  ;;  %v195_v2 = vld [vmem:[%s1961_s24 + $0x10] sm:$0xff]  ;;  %v194_v3 = vld [vmem:[%s1961_s24 + $0x8] sm:$0xff]  ;;  %vm214_vm0 = vcmask 261120   ;;  %s1779_s16 = sshll.u32 %s2997_s0, 7  ;;  %s1780_s23 = sshll.u32 %s2998_s1, 7 }
  0x20   :  { %v1998_v4 = vand.u32 4294901760, %v196_v1  ;;  %v2000_v5 = vand.u32 4294901760, %v195_v2  ;;  %v2002_v6 = vand.u32 4294901760, %v194_v3  ;;  %v193_v7 = vld [vmem:[%s1961_s24] sm:$0xff]  ;;  %v186_v9 = vld [vmem:[%s1966_s27 + $0x48] sm:$0xff]  ;;  %v187_v14 = vld [vmem:[%s1966_s27 + $0x50] sm:$0xff]  ;;  %p1622_p3 = scmp.eq.s32.totalorder %s2997_s0, %s2998_s1 }
  0x21   :  { %v185_v8 = vld [vmem:[%s1966_s27 + $0x40] sm:$0xff]  ;;  %v2007_v10 = vand.u32 4294901760, %v193_v7  ;;  %v243_v12 = vsel %vm214_vm0, %v186_v9, 0  ;;  %v246_v22 = vsel %vm214_vm0, %v187_v14, 0  ;;  %v178_v37 = vld [vmem:[%s1966_s27 + $0x8] sm:$0xff]  ;;  %v179_v38 = vld [vmem:[%s1966_s27 + $0x10] sm:$0xff] }
  0x22   :  { %v240_v11 = vsel %vm214_vm0, %v185_v8, 0  ;;  %v177_v13 = vld [vmem:[%s1966_s27] sm:$0xff]  ;;  %1782 = vmatpush.msra.mxu2 %v1998_v4  ;;  %v425_v15 = vsub.f32 %v196_v1, %v1998_v4  ;;  %v431_v17 = vsub.f32 %v195_v2, %v2000_v5  ;;  %v437_v18 = vsub.f32 %v194_v3, %v2002_v6  ;;  %276 = vmatpush.msra.mxu0 %v1998_v4  ;;  %v188_v47 = vld [vmem:[%s1966_s27 + $0x58] sm:$0xff]  ;;  %s1623_s28 = scalar_select %p1622_p3, 1, 0 }
  0x23   :  { %v2015_v16 = vand.u32 4294901760, %v240_v11  ;;  %v2021_v19 = vsub.f32 %v193_v7, %v2007_v10  ;;  %v2023_v20 = vand.u32 4294901760, %v243_v12  ;;  %v216_v21 = vsel %vm214_vm0, %v177_v13, 0  ;;  %v180_v58 = vld [vmem:[%s1966_s27 + $0x18] sm:$0xff]  ;;  %v189_v2 = vld [vmem:[%s1966_s27 + $0x60] sm:$0xff]  ;;  %p1781_p4 = scmp.ne.s32.totalorder %s2998_s1, 0 }
  0x24   :  { %1783 = vmatpush.msra.mxu2 %v2000_v5  ;;  %v426_v23 = vand.u32 4294901760, %v425_v15  ;;  %v432_v25 = vand.u32 4294901760, %v431_v17  ;;  %v438_v26 = vand.u32 4294901760, %v437_v18  ;;  %278 = vmatpush.msra.mxu0 %v2000_v5  ;;  %v2036_v29 = vand.u32 4294901760, %v216_v21 }
  0x25   :  { %v2029_v24 = vsub.f32 %v240_v11, %v2015_v16  ;;  %v444_v27 = vand.u32 4294901760, %v2021_v19  ;;  %v2034_v28 = vsub.f32 %v243_v12, %v2023_v20  ;;  %v2047_v36 = vand.u32 4294901760, %v246_v22  ;;  %v181_v12 = vld [vmem:[%s1966_s27 + $0x20] sm:$0xff] }
  0x26   :  { %1784 = vmatpush.msra.mxu2 %v2002_v6  ;;  %v427_v30 = vsub.f32 %v425_v15, %v426_v23  ;;  %v433_v32 = vsub.f32 %v431_v17, %v432_v25  ;;  %v439_v33 = vsub.f32 %v437_v18, %v438_v26  ;;  %280 = vmatpush.msra.mxu0 %v2002_v6  ;;  %v219_v46 = vsel %vm214_vm0, %v178_v37, 0 }
  0x27   :  { %v349_v31 = vand.u32 4294901760, %v2029_v24  ;;  %v445_v34 = vsub.f32 %v2021_v19, %v444_v27  ;;  %v2045_v35 = vsub.f32 %v216_v21, %v2036_v29  ;;  %v357_v42 = vand.u32 4294901760, %v2034_v28 }
  0x28   :  { %1785 = vmatpush.msra.mxu2 %v2007_v10  ;;  %v428_v39 = vand.u32 4294901760, %v427_v30  ;;  %v434_v41 = vand.u32 4294901760, %v433_v32  ;;  %282 = vmatpush.msra.mxu0 %v2007_v10  ;;  %v440_v45 = vand.u32 4294901760, %v439_v33  ;;  %v222_v48 = vsel %vm214_vm0, %v179_v38, 0  ;;  %v191_v38 = vld [vmem:[%s1966_s27 + $0x70] sm:$0xff] }
  0x29   :  { %v350_v40 = vsub.f32 %v2029_v24, %v349_v31  ;;  %v285_v43 = vand.u32 4294901760, %v2045_v35  ;;  %v2064_v50 = vand.u32 4294901760, %v219_v46  ;;  %v446_v51 = vand.u32 4294901760, %v445_v34 }
  0x2a   :  { %527 = vmatpush.msrb.mxu2 %v425_v15  ;;  %750 = vmatpush.msrb.mxu0 %v426_v23  ;;  %v358_v52 = vsub.f32 %v2034_v28, %v357_v42  ;;  %v2070_v53 = vsub.f32 %v246_v22, %v2047_v36  ;;  %v2072_v54 = vand.u32 4294901760, %v222_v48  ;;  %v249_v57 = vsel %vm214_vm0, %v188_v47, 0  ;;  %v183_v47 = vld [vmem:[%s1966_s27 + $0x30] sm:$0xff] }
  0x2b   :  { %1786 = vmatpush.msra.mxu3 %v428_v39  ;;  %v351_v44 = vand.u32 4294901760, %v350_v40  ;;  %429 = vmatpush.msra.mxu1 %v428_v39  ;;  %v286_v49 = vsub.f32 %v2045_v35, %v285_v43  ;;  %v2075_v56 = vsub.f32 %v219_v46, %v2064_v50  ;;  %v2084_v63 = vand.u32 4294901760, %v249_v57 }
  0x2c   :  { %530 = vmatpush.msrb.mxu2 %v431_v17  ;;  %754 = vmatpush.msrb.mxu0 %v432_v25  ;;  %v2081_v60 = vsub.f32 %v222_v48, %v2072_v54  ;;  %v359_v61 = vand.u32 4294901760, %v358_v52  ;;  %v365_v62 = vand.u32 4294901760, %v2070_v53  ;;  %v225_v0 = vsel %vm214_vm0, %v180_v58, 0  ;;  %v192_v58 = vld [vmem:[%s1966_s27 + $0x78] sm:$0xff] }
  0x2d   :  { %352 = vmatmul.f32.vlgmr.msra.gmra.mxu2 %v351_v44  ;;  %1787 = vmatpush.msra.mxu3 %v434_v41  ;;  %v287_v55 = vand.u32 4294901760, %v286_v49  ;;  %v293_v59 = vand.u32 4294901760, %v2075_v56  ;;  %v2097_v8 = vand.u32 4294901760, %v225_v0  ;;  %v2106_v11 = vsub.f32 %v249_v57, %v2084_v63 }
  0x2e   :  { %435 = vmatpush.msra.mxu1 %v434_v41  ;;  %533 = vmatpush.msrb.mxu2 %v437_v18  ;;  %v301_v7 = vand.u32 4294901760, %v2081_v60  ;;  %v366_v9 = vsub.f32 %v2070_v53, %v365_v62  ;;  %v258_v46 = vsel %vm214_vm0, %v191_v38, 0  ;;  %v234_v57 = vsel %vm214_vm0, %v183_v47, 0 }
  0x2f   :  { %1788 = vmatpush.msra.mxu3 %v440_v45  ;;  %758 = vmatpush.msrb.mxu0 %v438_v26  ;;  %v294_v1 = vsub.f32 %v2075_v56, %v293_v59  ;;  %v2116_v14 = vsub.f32 %v225_v0, %v2097_v8  ;;  %v373_v17 = vand.u32 4294901760, %v2106_v11  ;;  %v1890_v47 = vmov 0  }
  0x30   :  { %441 = vmatpush.msra.mxu1 %v440_v45  ;;  %288 = vmatmul.f32.vlgmr.msra.gmra.mxu0 %v287_v55  ;;  %v302_v13 = vsub.f32 %v2081_v60, %v301_v7  ;;  %v367_v15 = vand.u32 4294901760, %v366_v9  ;;  %v2170_v55 = vand.u32 4294901760, %v258_v46  ;;  %v261_v9 = vsel %vm214_vm0, %v192_v58, 0  ;;  %v197_v58 = vld [vmem:[%s1971_s30] sm:$0xff] }
  0x31   :  { %1789 = vmatpush.msra.mxu3 %v446_v51  ;;  %536 = vmatpush.msrb.mxu2 %v2021_v19  ;;  %v295_v3 = vand.u32 4294901760, %v294_v1  ;;  %v190_v19 = vld [vmem:[%s1966_s27 + $0x68] sm:$0xff]  ;;  %v374_v23 = vsub.f32 %v2106_v11, %v373_v17  ;;  %v2177_v1 = vand.u32 4294901760, %v234_v57 }
  0x32   :  { %481 = vmatmul.f32.vlgmr.msra.gmra.mxu3 %v2015_v16  ;;  %447 = vmatpush.msra.mxu1 %v446_v51  ;;  %v303_v21 = vand.u32 4294901760, %v302_v13  ;;  %v255_v26 = vsel %vm214_vm0, %v190_v19, 0  ;;  %v2194_v19 = vand.u32 4294901760, %v261_v9 }
  0x33   :  { %631 = vmatpush.msrb.mxu3 %v1998_v4  ;;  %449 = vmatmul.f32.vlgmr.msra.gmra.mxu1 %v2036_v29  ;;  %v375_v32 = vand.u32 4294901760, %v374_v23  ;;  %v2146_v34 = vand.u32 4294901760, %v255_v26  ;;  %v2191_v13 = vsub.f32 %v234_v57, %v2177_v1 }
  0x34   :  { %841 = vmatpush.msrb.mxu1 %v1998_v4  ;;  %762 = vmatpush.msrb.mxu0 %v444_v27  ;;  %v252_v4 = vsel %vm214_vm0, %v189_v2, 0 }
  0x35   :  { %360 = vmatmul.f32.gmra.mxu2 %v359_v61  ;;  %633 = vmatpush.msrb.mxu3 %v2000_v5  ;;  %v2120_v18 = vand.u32 4294901760, %v252_v4  ;;  %v2159_v45 = vsub.f32 %v255_v26, %v2146_v34  ;;  %v333_v26 = vand.u32 4294901760, %v2191_v13 }
  0x36   :  { %843 = vmatpush.msrb.mxu1 %v2000_v5  ;;  %v228_v5 = vsel %vm214_vm0, %v181_v12, 0  ;;  %1794 = vset.pattern.permute.xlu1 %v1890_v47 }
  0x37   :  { %635 = vmatpush.msrb.mxu3 %v2002_v6  ;;  %v2129_v22 = vand.u32 4294901760, %v228_v5  ;;  %v2135_v25 = vsub.f32 %v252_v4, %v2120_v18  ;;  %v389_v52 = vand.u32 4294901760, %v2159_v45  ;;  %v184_v4 = vld [vmem:[%s1966_s27 + $0x38] sm:$0xff]  ;;  %1793 = vset.pattern.permute.xlu0 %v1890_v47 }
  0x38   :  { %296 = vmatmul.f32.gmra.mxu0 %v295_v3  ;;  %845 = vmatpush.msrb.mxu1 %v2002_v6  ;;  %v309_v6 = vand.u32 4294901760, %v2116_v14  ;;  %v2183_v3 = vsub.f32 %v258_v46, %v2170_v55  ;;  %v199_v46 = vld [vmem:[%s1971_s30 + $0x10] sm:$0xff] }
  0x39   :  { %637 = vmatpush.msrb.mxu3 %v2007_v10  ;;  %v2143_v30 = vsub.f32 %v228_v5, %v2129_v22  ;;  %v381_v33 = vand.u32 4294901760, %v2135_v25  ;;  %v390_v2 = vsub.f32 %v2159_v45, %v389_v52  ;;  %925 = vperm.xlu1 %1794, %v199_v46  }
  0x3a   :  { %485 = vmatmul.f32.gmra.mxu3 %v2023_v20  ;;  %847 = vmatpush.msrb.mxu1 %v2007_v10  ;;  %v182_v10 = vld [vmem:[%s1966_s27 + $0x28] sm:$0xff]  ;;  %v310_v27 = vsub.f32 %v2116_v14, %v309_v6  ;;  %v397_v5 = vand.u32 4294901760, %v2183_v3 }
  0x3b   :  { %453 = vmatmul.f32.gmra.mxu1 %v2064_v50  ;;  %v231_v37 = vsel %vm214_vm0, %v182_v10, 0  ;;  %v317_v40 = vand.u32 4294901760, %v2143_v30  ;;  %v382_v44 = vsub.f32 %v2135_v25, %v381_v33  ;;  %1795 = vset.pattern.permute.xlu2 %v1890_v47 }
  0x3c   :  { %v311_v39 = vand.u32 4294901760, %v310_v27  ;;  %v2153_v41 = vand.u32 4294901760, %v231_v37  ;;  %v398_v27 = vsub.f32 %v2183_v3, %v397_v5  ;;  %915 = vperm.xlu0 %1793, %v197_v58  }
  0x3d   :  { %368 = vmatmul.f32.gmra.mxu2 %v367_v15  ;;  %v318_v48 = vsub.f32 %v2143_v30, %v317_v40  ;;  %v383_v51 = vand.u32 4294901760, %v382_v44  ;;  %v391_v15 = vand.u32 4294901760, %v390_v2 }
  0x3e   :  { %v2167_v49 = vsub.f32 %v231_v37, %v2153_v41  ;;  %v334_v37 = vsub.f32 %v2191_v13, %v333_v26 }
  0x3f   :  { %v319_v61 = vand.u32 4294901760, %v318_v48 }
  0x40   :  { %304 = vmatmul.f32.gmra.mxu0 %v303_v21  ;;  %v325_v0 = vand.u32 4294901760, %v2167_v49  ;;  %v237_v21 = vsel %vm214_vm0, %v184_v4, 0  ;;  %v335_v48 = vand.u32 4294901760, %v334_v37  ;;  %v201_v37 = vld [vmem:[%s1971_s30 + $0x20] sm:$0xff] }
  0x41   :  { %v2200_v10 = vand.u32 4294901760, %v237_v21  ;;  %935 = vperm.xlu2 %1795, %v201_v37  }
  0x42   :  { %489 = vmatmul.f32.gmra.mxu3 %v2047_v36  ;;  %v326_v12 = vsub.f32 %v2167_v49, %v325_v0 }
  0x43   :  { %457 = vmatmul.f32.gmra.mxu1 %v2072_v54  ;;  %v2212_v38 = vsub.f32 %v237_v21, %v2200_v10  ;;  %v203_v21 = vld [vmem:[%s1971_s30 + $0x30] sm:$0xff] }
  0x44   :  { %v327_v23 = vand.u32 4294901760, %v326_v12  ;;  %v198_v12 = vld [vmem:[%s1971_s30 + $0x8] sm:$0xff] }
  0x45   :  { %376 = vmatmul.f32.gmra.mxu2 %v375_v32  ;;  %v2206_v32 = vsub.f32 %v261_v9, %v2194_v19  ;;  %v200_v9 = vld [vmem:[%s1971_s30 + $0x18] sm:$0xff]  ;;  %920 = vperm.xlu0 %1793, %v198_v12  }
  0x46   :  { %930 = vperm.xlu1 %1794, %v200_v9  }
  0x47   :  { %v405_v44 = vand.u32 4294901760, %v2206_v32 }
  0x48   :  { %312 = vmatmul.f32.gmra.mxu0 %v311_v39  ;;  %v399_v39 = vand.u32 4294901760, %v398_v27  ;;  %v206_v27 = vld [vmem:[%s1971_s30 + $0x48] sm:$0xff] }
  0x49   :  { %v406_v57 = vsub.f32 %v2206_v32, %v405_v44 }
  0x4a   :  { %493 = vmatmul.f32.gmra.mxu3 %v2084_v63 }
  0x4b   :  { %461 = vmatmul.f32.gmra.mxu1 %v2097_v8  ;;  %v407_v2 = vand.u32 4294901760, %v406_v57 }
  0x4d   :  { %384 = vmatmul.f32.gmra.mxu2 %v383_v51  ;;  %v341_v51 = vand.u32 4294901760, %v2212_v38  ;;  %945 = vperm.xlu0 %1793, %v203_v21  }
  0x50   :  { %320 = vmatmul.f32.gmra.mxu0 %v319_v61  ;;  %v342_v61 = vsub.f32 %v2212_v38, %v341_v51 }
  0x52   :  { %497 = vmatmul.f32.gmra.mxu3 %v2120_v18  ;;  %v343_v4 = vand.u32 4294901760, %v342_v61  ;;  %v1366_v61 = vld [vmem:[%s1976_s13 + $0x38] sm:$0xff] }
  0x53   :  { %465 = vmatmul.f32.gmra.mxu1 %v2129_v22 }
  0x55   :  { %392 = vmatmul.f32.gmra.mxu2 %v391_v15  ;;  %v204_v15 = vld [vmem:[%s1971_s30 + $0x38] sm:$0xff]  ;;  %960 = vperm.xlu0 %1793, %v206_v27  }
  0x56   :  { %950 = vperm.xlu1 %1794, %v204_v15  }
  0x58   :  { %328 = vmatmul.f32.gmra.mxu0 %v327_v23  ;;  %v207_v23 = vld [vmem:[%s1971_s30 + $0x50] sm:$0xff] }
  0x5a   :  { %501 = vmatmul.f32.gmra.mxu3 %v2146_v34 }
  0x5b   :  { %469 = vmatmul.f32.gmra.mxu1 %v2153_v41 }
  0x5d   :  { %400 = vmatmul.f32.gmra.mxu2 %v399_v39 }
  0x5e   :  { %965 = vperm.xlu1 %1794, %v207_v23   ;;  %v1372_v23 = vld [vmem:[%s1976_s13 + $0x68] sm:$0xff] }
  0x60   :  { %336 = vmatmul.f32.gmra.mxu0 %v335_v48 }
  0x62   :  { %505 = vmatmul.f32.gmra.mxu3 %v2170_v55 }
  0x63   :  { %473 = vmatmul.f32.gmra.mxu1 %v2177_v1 }
  0x65   :  { %408 = vmatmul.f32.gmra.mxu2 %v407_v2 }
  0x68   :  { %344 = vmatmul.f32.gmra.mxu0 %v343_v4  ;;  %v1369_v4 = vld [vmem:[%s1976_s13 + $0x50] sm:$0xff] }
  0x6a   :  { %509 = vmatmul.f32.gmra.mxu3 %v2194_v19 }
  0x6b   :  { %477 = vmatmul.f32.gmra.mxu1 %v2200_v10 }
  0x6d   :  { %539 = vmatmul.f32.vlgmr.msrb.gmra.mxu2 %v2045_v35  ;;  %v210_v35 = vld [vmem:[%s1971_s30 + $0x68] sm:$0xff] }
  0x6e   :  { %980 = vperm.xlu1 %1794, %v210_v35  }
  0x70   :  { %764 = vmatmul.f32.vlgmr.msrb.gmra.mxu0 %v2036_v29 }
  0x72   :  { %641 = vmatmul.f32.vlgmr.msrb.gmra.mxu3 %v285_v43  ;;  %v202_v43 = vld [vmem:[%s1971_s30 + $0x28] sm:$0xff] }
  0x73   :  { %849 = vmatmul.f32.vlgmr.msrb.gmra.mxu1 %v2036_v29  ;;  %v209_v29 = vld [vmem:[%s1971_s30 + $0x60] sm:$0xff]  ;;  %940 = vperm.xlu2 %1795, %v202_v43  }
  0x74   :  { %975 = vperm.xlu0 %1793, %v209_v29  }
  0x75   :  { %544 = vmatmul.f32.gmra.mxu2 %v2075_v56  ;;  %v1359_v56 = vld [vmem:[%s1976_s13] sm:$0xff] }
  0x76   :  { %1377 = vperm.xlu1 %1794, %v1359_v56  }
  0x78   :  { %768 = vmatmul.f32.gmra.mxu0 %v2064_v50 }
  0x7a   :  { %647 = vmatmul.f32.gmra.mxu3 %v293_v59  ;;  %v205_v59 = vld [vmem:[%s1971_s30 + $0x40] sm:$0xff] }
  0x7b   :  { %853 = vmatmul.f32.gmra.mxu1 %v2064_v50  ;;  %v212_v50 = vld [vmem:[%s1971_s30 + $0x78] sm:$0xff]  ;;  %955 = vperm.xlu2 %1795, %v205_v59  }
  0x7c   :  { %990 = vperm.xlu0 %1793, %v212_v50  }
  0x7d   :  { %549 = vmatmul.f32.gmra.mxu2 %v2081_v60  ;;  %v208_v60 = vld [vmem:[%s1971_s30 + $0x58] sm:$0xff] }
  0x80   :  { %772 = vmatmul.f32.gmra.mxu0 %v2072_v54 }
  0x82   :  { %653 = vmatmul.f32.gmra.mxu3 %v301_v7  ;;  %v1362_v7 = vld [vmem:[%s1976_s13 + $0x18] sm:$0xff] }
  0x83   :  { %857 = vmatmul.f32.gmra.mxu1 %v2072_v54  ;;  %v1361_v54 = vld [vmem:[%s1976_s13 + $0x10] sm:$0xff]  ;;  %970 = vperm.xlu2 %1795, %v208_v60  }
  0x84   :  { %1383 = vperm.xlu0 %1793, %v1361_v54   ;;  %1386 = vperm.xlu1 %1794, %v1362_v7   ;;  %v2395_v7 = vld [vmem:[%s132_s20] ss:$0 sm:$0xff] }
  0x85   :  { %554 = vmatmul.f32.gmra.mxu2 %v2116_v14  ;;  %v211_v14 = vld [vmem:[%s1971_s30 + $0x70] sm:$0xff] }
  0x88   :  { %776 = vmatmul.f32.gmra.mxu0 %v2097_v8 }
  0x8a   :  { %659 = vmatmul.f32.gmra.mxu3 %v309_v6  ;;  %v1365_v6 = vld [vmem:[%s1976_s13 + $0x30] sm:$0xff] }
  0x8b   :  { %861 = vmatmul.f32.gmra.mxu1 %v2097_v8  ;;  %v1364_v8 = vld [vmem:[%s1976_s13 + $0x28] sm:$0xff]  ;;  %985 = vperm.xlu2 %1795, %v211_v14  }
  0x8c   :  { %1392 = vperm.xlu0 %1793, %v1364_v8   ;;  %1395 = vperm.xlu1 %1794, %v1365_v6  }
  0x8d   :  { %559 = vmatmul.f32.gmra.mxu2 %v2143_v30  ;;  %v1360_v30 = vld [vmem:[%s1976_s13 + $0x8] sm:$0xff] }
  0x90   :  { %780 = vmatmul.f32.gmra.mxu0 %v2129_v22 }
  0x92   :  { %665 = vmatmul.f32.gmra.mxu3 %v317_v40  ;;  %v1368_v40 = vld [vmem:[%s1976_s13 + $0x48] sm:$0xff] }
  0x93   :  { %865 = vmatmul.f32.gmra.mxu1 %v2129_v22  ;;  %v1367_v22 = vld [vmem:[%s1976_s13 + $0x40] sm:$0xff]  ;;  %1380 = vperm.xlu2 %1795, %v1360_v30  }
  0x94   :  { %1401 = vperm.xlu0 %1793, %v1367_v22   ;;  %1404 = vperm.xlu1 %1794, %v1368_v40  }
  0x95   :  { %564 = vmatmul.f32.gmra.mxu2 %v2167_v49  ;;  %v1371_v49 = vld [vmem:[%s1976_s13 + $0x60] sm:$0xff] }
  0x98   :  { %784 = vmatmul.f32.gmra.mxu0 %v2153_v41 }
  0x9a   :  { %671 = vmatmul.f32.gmra.mxu3 %v325_v0 }
  0x9b   :  { %869 = vmatmul.f32.gmra.mxu1 %v2153_v41  ;;  %v1370_v41 = vld [vmem:[%s1976_s13 + $0x58] sm:$0xff]  ;;  %v2360_v37 = vpop.permute.xlu2 %935 }
  0x9c   :  { %1410 = vperm.xlu0 %1793, %v1370_v41   ;;  %1413 = vperm.xlu1 %1794, %v1371_v49  }
  0x9d   :  { %569 = vmatmul.f32.gmra.mxu2 %v2191_v13 }
  0xa0   :  { %788 = vmatmul.f32.gmra.mxu0 %v2177_v1 }
  0xa2   :  { %677 = vmatmul.f32.gmra.mxu3 %v333_v26  ;;  %v1373_v26 = vld [vmem:[%s1976_s13 + $0x70] sm:$0xff] }
  0xa3   :  { %873 = vmatmul.f32.gmra.mxu1 %v2177_v1 }
  0xa4   :  { %1419 = vperm.xlu0 %1793, %v1373_v26  }
  0xa5   :  { %574 = vmatmul.f32.gmra.mxu2 %v2212_v38  ;;  %v1374_v38 = vld [vmem:[%s1976_s13 + $0x78] sm:$0xff] }
  0xa6   :  { %1422 = vperm.xlu1 %1794, %v1374_v38  }
  0xa8   :  { %792 = vmatmul.f32.gmra.mxu0 %v2200_v10 }
  0xaa   :  { %683 = vmatmul.f32.gmra.mxu3 %v341_v51  ;;  %v1363_v51 = vld [vmem:[%s1976_s13 + $0x20] sm:$0xff] }
  0xab   :  { %877 = vmatmul.f32.gmra.mxu1 %v2200_v10  ;;  %1389 = vperm.xlu2 %1795, %v1363_v51   ;;  %v2346_v12 = vpop.permute.xlu1 %925 }
  0xad   :  { %579 = vmatmul.f32.gmra.mxu2 %v2029_v24  ;;  %v2295_v0 = vpop.f32.mrf.mxu0 }
  0xb0   :  { %v353_v1 = vpop.f32.mrf.mxu2  ;;  %v2297_v13 = vpop.f32.mrf.mxu1  ;;  %796 = vmatmul.f32.gmra.mxu0 %v2015_v16 }
  0xb2   :  { %689 = vmatmul.f32.gmra.mxu3 %v349_v31 }
  0xb3   :  { %881 = vmatmul.f32.gmra.mxu1 %v2015_v16  ;;  %1398 = vperm.xlu2 %1795, %v1366_v61  }
  0xb5   :  { %584 = vmatmul.f32.gmra.mxu2 %v2034_v28  ;;  %v482_v10 = vpop.f32.mrf.mxu3  ;;  %v2306_v39 = vpop.f32.mrf.mxu0 }
  0xb6   :  { %v2308_v46 = vadd.f32 %v482_v10, %v353_v1 }
  0xb8   :  { %v361_v47 = vpop.f32.mrf.mxu2  ;;  %v2310_v48 = vpop.f32.mrf.mxu1  ;;  %800 = vmatmul.f32.gmra.mxu0 %v2023_v20 }
  0xb9   :  { %v2362_v35 = vpop.permute.xlu1 %930 }
  0xba   :  { %695 = vmatmul.f32.gmra.mxu3 %v357_v42 }
  0xbb   :  { %885 = vmatmul.f32.gmra.mxu1 %v2023_v20  ;;  %1407 = vperm.xlu2 %1795, %v1369_v4  }
  0xbd   :  { %589 = vmatmul.f32.gmra.mxu2 %v2070_v53  ;;  %v486_v16 = vpop.f32.mrf.mxu3  ;;  %v2318_v24 = vpop.f32.mrf.mxu0 }
  0xbe   :  { %v2320_v31 = vadd.f32 %v486_v16, %v361_v47 }
  0xc0   :  { %v369_v57 = vpop.f32.mrf.mxu2  ;;  %v2322_v58 = vpop.f32.mrf.mxu1  ;;  %804 = vmatmul.f32.gmra.mxu0 %v2047_v36 }
  0xc2   :  { %701 = vmatmul.f32.gmra.mxu3 %v365_v62 }
  0xc3   :  { %889 = vmatmul.f32.gmra.mxu1 %v2047_v36  ;;  %1416 = vperm.xlu2 %1795, %v1372_v23   ;;  %v455_v23 = vadd.f32 %v2310_v48, %v2306_v39 }
  0xc5   :  { %594 = vmatmul.f32.gmra.mxu2 %v2106_v11  ;;  %v490_v20 = vpop.f32.mrf.mxu3  ;;  %v2330_v28 = vpop.f32.mrf.mxu0 }
  0xc6   :  { %v2332_v42 = vadd.f32 %v490_v20, %v369_v57 }
  0xc8   :  { %v377_v2 = vpop.f32.mrf.mxu2  ;;  %v2334_v9 = vpop.f32.mrf.mxu1  ;;  %808 = vmatmul.f32.gmra.mxu0 %v2084_v63 }
  0xc9   :  { %v2377_v59 = vpop.permute.xlu1 %950 }
  0xca   :  { %707 = vmatmul.f32.gmra.mxu3 %v373_v17 }
  0xcb   :  { %893 = vmatmul.f32.gmra.mxu1 %v2084_v63  ;;  %v916_v63 = vpop.permute.xlu0 %915 }
  0xcd   :  { %599 = vmatmul.f32.gmra.mxu2 %v2135_v25  ;;  %v494_v36 = vpop.f32.mrf.mxu3  ;;  %v2342_v53 = vpop.f32.mrf.mxu0 }
  0xce   :  { %v2344_v62 = vadd.f32 %v494_v36, %v377_v2  ;;  %v2375_v50 = vpop.permute.xlu2 %940 }
  0xd0   :  { %v385_v15 = vpop.f32.mrf.mxu2  ;;  %v2348_v21 = vpop.f32.mrf.mxu1  ;;  %812 = vmatmul.f32.gmra.mxu0 %v2120_v18 }
  0xd2   :  { %713 = vmatmul.f32.gmra.mxu3 %v381_v33 }
  0xd3   :  { %897 = vmatmul.f32.gmra.mxu1 %v2120_v18  ;;  %v921_v56 = vpop.permute.xlu0 %920 }
  0xd5   :  { %604 = vmatmul.f32.gmra.mxu2 %v2159_v45  ;;  %v498_v11 = vpop.f32.mrf.mxu3  ;;  %v2356_v17 = vpop.f32.mrf.mxu0 }
  0xd6   :  { %v2358_v27 = vadd.f32 %v498_v11, %v385_v15  ;;  %v2399_v14 = vpop.permute.xlu2 %955 }
  0xd8   :  { %v393_v29 = vpop.f32.mrf.mxu2  ;;  %v2364_v43 = vpop.f32.mrf.mxu1  ;;  %816 = vmatmul.f32.gmra.mxu0 %v2146_v34 }
  0xda   :  { %719 = vmatmul.f32.gmra.mxu3 %v389_v52 }
  0xdb   :  { %901 = vmatmul.f32.gmra.mxu1 %v2146_v34  ;;  %v2397_v8 = vpop.permute.xlu0 %945 }
  0xdd   :  { %609 = vmatmul.f32.gmra.mxu2 %v2183_v3  ;;  %v502_v18 = vpop.f32.mrf.mxu3  ;;  %v2371_v25 = vpop.f32.mrf.mxu0 }
  0xde   :  { %v2373_v33 = vadd.f32 %v502_v18, %v393_v29  ;;  %v966_v3 = vpop.permute.xlu1 %965  ;;  %v971_v49 = vpop.permute.xlu2 %970 }
  0xdf   :  { %v2405_v6 = vadd.f32 %v2395_v7, %v966_v3  ;;  %v2415_v10 = vadd.f32 %v2395_v7, %v971_v49 }
  0xe0   :  { %v401_v54 = vpop.f32.mrf.mxu2  ;;  %v2379_v60 = vpop.f32.mrf.mxu1  ;;  %820 = vmatmul.f32.gmra.mxu0 %v2170_v55 }
  0xe2   :  { %725 = vmatmul.f32.gmra.mxu3 %v397_v5 }
  0xe3   :  { %905 = vmatmul.f32.gmra.mxu1 %v2170_v55  ;;  %v2412_v41 = vpop.permute.xlu0 %960 }
  0xe5   :  { %614 = vmatmul.f32.gmra.mxu2 %v2206_v32  ;;  %v506_v34 = vpop.f32.mrf.mxu3  ;;  %v2386_v45 = vpop.f32.mrf.mxu0  ;;  %v451_v32 = vadd.f32 %v2297_v13, %v2295_v0  ;;  %v996_v0 = vadd.f32 %v2395_v7, %v916_v63 }
  0xe6   :  { %v2388_v52 = vadd.f32 %v506_v34, %v401_v54  ;;  %v981_v1 = vpop.permute.xlu1 %980  ;;  %v986_v61 = vpop.permute.xlu2 %985 }
  0xe7   :  { %v2418_v47 = vadd.f32 %v2395_v7, %v981_v1  ;;  %v2426_v15 = vadd.f32 %v2395_v7, %v986_v61  ;;  %v459_v1 = vadd.f32 %v2322_v58, %v2318_v24 }
  0xe8   :  { %v409_v5 = vpop.f32.mrf.mxu2  ;;  %v2401_v55 = vpop.f32.mrf.mxu1  ;;  %824 = vmatmul.f32.gmra.mxu0 %v2194_v19 }
  0xea   :  { %731 = vmatmul.f32.gmra.mxu3 %v405_v44 }
  0xeb   :  { %909 = vmatmul.f32.gmra.mxu1 %v2194_v19  ;;  %v976_v57 = vpop.permute.xlu0 %975 }
  0xec   :  { %v2423_v36 = vadd.f32 %v2395_v7, %v976_v57 }
  0xed   :  { %v510_v22 = vpop.f32.mrf.mxu3  ;;  %v765_v30 = vpop.f32.mrf.mxu0 }
  0xee   :  { %v2410_v40 = vadd.f32 %v510_v22, %v409_v5 }
  0xf0   :  { %v540_v26 = vpop.f32.mrf.mxu2  ;;  %v850_v38 = vpop.f32.mrf.mxu1 }
  0xf1   :  { %v541_v19 = vadd.f32 %v540_v26, %v451_v32  ;;  %v997_v26 = vadd.f32 %v2395_v7, %v921_v56 }
  0xf5   :  { %v642_v44 = vpop.f32.mrf.mxu3  ;;  %v769_v51 = vpop.f32.mrf.mxu0 }
  0xf6   :  { %v643_v16 = vadd.f32 %v642_v44, %v541_v19 }
  0xf8   :  { %v545_v20 = vpop.f32.mrf.mxu2  ;;  %v766_v2 = vadd.f32 %v765_v30, %v643_v16  ;;  %v854_v4 = vpop.f32.mrf.mxu1 }
  0xf9   :  { %v546_v11 = vadd.f32 %v545_v20, %v455_v23 }
  0xfa   :  { %v851_v13 = vadd.f32 %v850_v38, %v766_v2  ;;  %v991_v38 = vpop.permute.xlu0 %990  ;;  %v463_v2 = vadd.f32 %v2334_v9, %v2330_v28 }
  0xfb   :  { %v2438_v44 = vadd.f32 %v2395_v7, %v991_v38 }
  0xfc   :  { %v1012_v29 = vmul.f32 2.0, %v851_v13 }
  0xfd   :  { %v648_v18 = vpop.f32.mrf.mxu3  ;;  %v773_v54 = vpop.f32.mrf.mxu0 }
  0xfe   :  { %v1028_v34 = vsub.f32 %v996_v0, %v1012_v29  ;;  %v649_v3 = vadd.f32 %v648_v18, %v546_v11  ;;  %v1253_v0 = vlaneseq }
 0x100   :  { %v2431_v5 = vmax.f32 %v1028_v34, 0.0  ;;  %v550_v22 = vpop.f32.mrf.mxu2  ;;  %v770_v30 = vadd.f32 %v769_v51, %v649_v3  ;;  %v858_v49 = vpop.f32.mrf.mxu1  ;;  %v2451_v28 = vshrl.u32 %v1253_v0, 7 }
 0x101   :  { %v551_v48 = vadd.f32 %v550_v22, %v459_v1 }
 0x102   :  { %v855_v39 = vadd.f32 %v854_v4, %v770_v30  ;;  %1798 = vrsqrt.f32 %v2431_v5  ;;  %v998_v4 = vadd.f32 %v2395_v7, %v2346_v12  ;;  %vm1067_vm1 = vcmp.eq.f32.partialorder %v2431_v5, inf }
 0x103   :  { %vm1069_vm2 = vcmp.eq.f32.partialorder %v2431_v5, 0.0 }
 0x104   :  { %v1013_v63 = vmul.f32 2.0, %v855_v39 }
 0x105   :  { %v654_v32 = vpop.f32.mrf.mxu3  ;;  %v777_v19 = vpop.f32.mrf.mxu0 }
 0x106   :  { %v1029_v16 = vsub.f32 %v997_v26, %v1013_v63  ;;  %v655_v57 = vadd.f32 %v654_v32, %v551_v48  ;;  %v2458_v26 = vstv %s1779_s16  ;;  %v467_v48 = vadd.f32 %v2348_v21, %v2342_v53 }
 0x107   :  { %v1289_v63 = vand.u32 127, %v1253_v0  ;;  %v1070_v21 = vand.u32 2147483648, %v2431_v5 }
 0x108   :  { %v1799_v51 = vpop.eup %1798  ;;  %v2440_v61 = vmax.f32 %v1029_v16, 0.0  ;;  %v555_v20 = vpop.f32.mrf.mxu2  ;;  %v774_v24 = vadd.f32 %v773_v54, %v655_v57  ;;  %v999_v16 = vadd.f32 %v2395_v7, %v2362_v35 }
 0x109   :  { %v862_v58 = vpop.f32.mrf.mxu1  ;;  %v1061_v56 = vmul.f32 %v1799_v51, %v2431_v5  ;;  %v556_v11 = vadd.f32 %v555_v20, %v463_v2  ;;  %v1290_v20 = vstv %s1780_s23 }
 0x10a   :  { %v859_v23 = vadd.f32 %v858_v49, %v774_v24  ;;  %1800 = vrsqrt.f32 %v2440_v61  ;;  %vm1079_vm7 = vcmp.eq.f32.partialorder %v2440_v61, inf  ;;  %vm1081_vm9 = vcmp.eq.f32.partialorder %v2440_v61, 0.0 }
 0x10b   :  { %v1062_v13 = vmul.f32 %v1799_v51, %v1061_v56 }
 0x10c   :  { %v1014_v29 = vmul.f32 2.0, %v859_v23 }
 0x10d   :  { %v660_v18 = vpop.f32.mrf.mxu3  ;;  %v1063_v54 = vmul.f32 0.5, %v1062_v13  ;;  %v781_v34 = vpop.f32.mrf.mxu0 }
 0x10e   :  { %v1030_v3 = vsub.f32 %v998_v4, %v1014_v29  ;;  %v661_v22 = vadd.f32 %v660_v18, %v556_v11  ;;  %v2471_v4 = vadd.s32 %v1290_v20, %v1289_v63  ;;  %v2476_v11 = vld [vmem:[%s1982_s3] ss:$0 sm:$0xff]  ;;  %v1255_v18 = vadd.s32 8, %v2451_v28 }
 0x10f   :  { %v1064_v9 = vsub.f32 1.5, %v1063_v54  ;;  %v1000_v54 = vadd.f32 %v2395_v7, %v2360_v37 }
 0x110   :  { %v1801_v12 = vpop.eup %1800  ;;  %v2456_v30 = vmax.f32 %v1030_v3, 0.0  ;;  %v560_v49 = vpop.f32.mrf.mxu2  ;;  %v778_v1 = vadd.f32 %v777_v19, %v661_v22  ;;  %v1271_v19 = vadd.s32 %v2458_v26, %v2451_v28  ;;  %vm1308_vm4 = vcmp.lt.s32.totalorder %v2471_v4, 8 }
 0x111   :  { %v866_v39 = vpop.f32.mrf.mxu1  ;;  %v1065_v38 = vmul.f32 %v1799_v51, %v1064_v9  ;;  %v1073_v32 = vmul.f32 %v1801_v12, %v2440_v61  ;;  %v561_v2 = vadd.f32 %v560_v49, %v467_v48  ;;  %v1378_v3 = vpop.permute.xlu1 %1377  ;;  %v1272_v20 = vadd.s32 %v2458_v26, %v1255_v18 }
 0x112   :  { %v863_v57 = vadd.f32 %v862_v58, %v778_v1  ;;  %1802 = vrsqrt.f32 %v2456_v30  ;;  %v471_v1 = vadd.f32 %v2364_v43, %v2356_v17  ;;  %vm1292_vm3 = vcmp.lt.s32.totalorder %v1271_v19, 8 }
 0x113   :  { %v1066_v24 = vmul.f32 %v1065_v38, %v2431_v5  ;;  %v1074_v56 = vmul.f32 %v1801_v12, %v1073_v32  ;;  %vm1425_vm5 = vcmp.ne.s32.totalorder %v1378_v3, %v2476_v11  ;;  %vm2496_vm8 = vmand %vm1292_vm3, %vm1308_vm4  ;;  %v475_v18 = vadd.f32 %v2379_v60, %v2371_v25 }
 0x114   :  { %v1015_v53 = vmul.f32 2.0, %v863_v57  ;;  %vm1293_vm11 = vcmp.lt.s32.totalorder %v1272_v20, 8  ;;  %vm1091_vm15 = vcmp.eq.f32.partialorder %v2456_v30, inf }
 0x115   :  { %v666_v51 = vpop.f32.mrf.mxu3  ;;  %v1068_v35 = vsel %vm1067_vm1, %v2431_v5, %v1066_v24  ;;  %v1075_v58 = vmul.f32 0.5, %v1074_v56  ;;  %v785_v23 = vpop.f32.mrf.mxu0  ;;  %vm2530_vm0 = vmand %vm1293_vm11, %vm1308_vm4  ;;  %vm1093_vm1 = vcmp.eq.f32.partialorder %v2456_v30, 0.0 }
 0x116   :  { %v1031_v0 = vsub.f32 %v999_v16, %v1015_v53  ;;  %v667_v13 = vadd.f32 %v666_v51, %v561_v2  ;;  %v1071_v29 = vsel %vm1069_vm2, %v1070_v21, %v1068_v35  ;;  %v1381_v56 = vpop.permute.xlu2 %1380  ;;  %v1256_v21 = vadd.s32 16, %v2451_v28 }
 0x117   :  { %v1489_v22 = vsub.f32 1.0, %v1071_v29  ;;  %v1076_v9 = vsub.f32 1.5, %v1075_v58  ;;  %vm1441_vm6 = vcmp.ne.f32.partialorder %v1071_v29, 0.0  ;;  %vm1426_vm12 = vcmp.ne.s32.totalorder %v1381_v56, %v2476_v11 }
 0x118   :  { %v1803_v49 = vpop.eup %1802  ;;  %v2483_v5 = vmax.f32 %v1031_v0, 0.0  ;;  %v565_v48 = vpop.f32.mrf.mxu2  ;;  %v782_v63 = vadd.f32 %v781_v34, %v667_v13  ;;  %vm2506_vm10 = vmand %vm1425_vm5, %vm1441_vm6 }
 0x119   :  { %v870_v38 = vpop.f32.mrf.mxu1  ;;  %v1505_v32 = vmul.f32 1.442695, %v1489_v22  ;;  %v1077_v16 = vmul.f32 %v1801_v12, %v1076_v9  ;;  %v1085_v57 = vmul.f32 %v1803_v49, %v2456_v30  ;;  %v566_v34 = vadd.f32 %v565_v48, %v471_v1  ;;  %v1553_v48 = vld [vmem:[#allocation2 + $0x30] sm:$0xff]  ;;  %vm1473_vm13 = vmand %vm2506_vm10, %vm2496_vm8 }
 0x11a   :  { %v867_v37 = vadd.f32 %v866_v39, %v782_v63  ;;  %1804 = vrsqrt.f32 %v2483_v5  ;;  %v1082_v12 = vand.u32 2147483648, %v2440_v61  ;;  %vm1103_vm8 = vcmp.eq.f32.partialorder %v2483_v5, inf }
 0x11b   :  { %1806 = vpow2.f32 %v1505_v32  ;;  %v1078_v17 = vmul.f32 %v1077_v16, %v2440_v61  ;;  %v1086_v43 = vmul.f32 %v1803_v49, %v1085_v57  ;;  %vm1105_vm10 = vcmp.eq.f32.partialorder %v2483_v5, 0.0 }
 0x11c   :  { %v1016_v24 = vmul.f32 2.0, %v867_v37 }
 0x11d   :  { %v672_v2 = vpop.f32.mrf.mxu3  ;;  %v1080_v53 = vsel %vm1079_vm7, %v2440_v61, %v1078_v17  ;;  %v1087_v51 = vmul.f32 0.5, %v1086_v43  ;;  %v789_v35 = vpop.f32.mrf.mxu0  ;;  %v1001_v61 = vadd.f32 %v2395_v7, %v2375_v50  ;;  %v1273_v50 = vadd.s32 %v2458_v26, %v1256_v21 }
 0x11e   :  { %v1032_v19 = vsub.f32 %v1000_v54, %v1016_v24  ;;  %v673_v0 = vadd.f32 %v672_v2, %v566_v34  ;;  %v1083_v13 = vsel %vm1081_vm9, %v1082_v12, %v1080_v53  ;;  %v1094_v12 = vand.u32 2147483648, %v2456_v30 }
 0x11f   :  { %v1490_v22 = vsub.f32 1.0, %v1083_v13  ;;  %v1088_v9 = vsub.f32 1.5, %v1087_v51  ;;  %vm1442_vm14 = vcmp.ne.f32.partialorder %v1083_v13, 0.0  ;;  %v1257_v2 = vadd.s32 24, %v2451_v28 }
 0x120   :  { %v1805_v1 = vpop.eup %1804  ;;  %v2514_v29 = vmax.f32 %v1032_v19, 0.0  ;;  %v570_v3 = vpop.f32.mrf.mxu2  ;;  %v786_v63 = vadd.f32 %v785_v23, %v673_v0  ;;  %vm2540_vm2 = vmand %vm1426_vm12, %vm1442_vm14  ;;  %v1002_v0 = vadd.f32 %v2395_v7, %v2397_v8  ;;  %vm1294_vm3 = vcmp.lt.s32.totalorder %v1273_v50, 8 }
 0x121   :  { %v874_v54 = vpop.f32.mrf.mxu1  ;;  %v1807_v32 = vpop.eup %1806  ;;  %v1507_v25 = vmul.f32 1.442695, %v1490_v22  ;;  %v1089_v60 = vmul.f32 %v1803_v49, %v1088_v9  ;;  %v1097_v16 = vmul.f32 %v1805_v1, %v2483_v5  ;;  %v571_v34 = vadd.f32 %v570_v3, %v475_v18  ;;  %vm1474_vm5 = vmand %vm2540_vm2, %vm2530_vm0 }
 0x122   :  { %v1537_v57 = vsel %vm1473_vm13, %v1807_v32, 0.0  ;;  %v871_v37 = vadd.f32 %v870_v38, %v786_v63  ;;  %v1384_v18 = vpop.permute.xlu0 %1383  ;;  %v479_v9 = vadd.f32 %v2401_v55, %v2386_v45  ;;  %vm2563_vm9 = vmand %vm1294_vm3, %vm1308_vm4  ;;  %vm1115_vm2 = vcmp.eq.f32.partialorder %v2514_v29, inf }
 0x123   :  { %v1569_v17 = vadd.f32 %v1553_v48, %v1537_v57  ;;  %1808 = vpow2.f32 %v1507_v25  ;;  %v1090_v23 = vmul.f32 %v1089_v60, %v2456_v30  ;;  %v1098_v43 = vmul.f32 %v1805_v1, %v1097_v16  ;;  %v1554_v48 = vld [vmem:[#allocation2] sm:$0xff] }
 0x124   :  { %v1017_v24 = vmul.f32 2.0, %v871_v37  ;;  %1810 = vrsqrt.f32 %v2514_v29  ;;  %vm1427_vm6 = vcmp.ne.s32.totalorder %v1384_v18, %v2476_v11  ;;  %vm1117_vm3 = vcmp.eq.f32.partialorder %v2514_v29, 0.0 }
 0x125   :  { %1585 = vst [vmem:[#allocation2 + $0x30] sm:$0xff] %v1569_v17  ;;  %v1092_v38 = vsel %vm1091_vm15, %v2456_v30, %v1090_v23  ;;  %v678_v39 = vpop.f32.mrf.mxu3  ;;  %v1099_v53 = vmul.f32 0.5, %v1098_v43  ;;  %v793_v21 = vpop.f32.mrf.mxu0  ;;  %v1106_v17 = vand.u32 2147483648, %v2483_v5 }
 0x126   :  { %v1033_v20 = vsub.f32 %v1001_v61, %v1017_v24  ;;  %v1095_v58 = vsel %vm1093_vm1, %v1094_v12, %v1092_v38  ;;  %v679_v19 = vadd.f32 %v678_v39, %v571_v34  ;;  %v1274_v61 = vadd.s32 %v2458_v26, %v1257_v2  ;;  %v1387_v39 = vpop.permute.xlu1 %1386 }
 0x127   :  { %v1491_v30 = vsub.f32 1.0, %v1095_v58  ;;  %v1100_v22 = vsub.f32 1.5, %v1099_v53  ;;  %vm1443_vm7 = vcmp.ne.f32.partialorder %v1095_v58, 0.0  ;;  %vm1428_vm13 = vcmp.ne.s32.totalorder %v1387_v39, %v2476_v11 }
 0x128   :  { %v2548_v13 = vmax.f32 %v1033_v20, 0.0  ;;  %v575_v56 = vpop.f32.mrf.mxu2  ;;  %v790_v3 = vadd.f32 %v789_v35, %v679_v19  ;;  %vm2573_vm11 = vmand %vm1427_vm6, %vm1443_vm7  ;;  %v1555_v20 = vld [vmem:[#allocation2 + $0x58] sm:$0xff]  ;;  %vm1295_vm12 = vcmp.lt.s32.totalorder %v1274_v61, 8 }
 0x129   :  { %v878_v63 = vpop.f32.mrf.mxu1  ;;  %v1809_v32 = vpop.eup %1808  ;;  %v1509_v8 = vmul.f32 1.442695, %v1491_v30  ;;  %v1101_v25 = vmul.f32 %v1805_v1, %v1100_v22  ;;  %v576_v23 = vadd.f32 %v575_v56, %v479_v9  ;;  %vm1475_vm14 = vmand %vm2573_vm11, %vm2563_vm9  ;;  %v1258_v9 = vadd.s32 32, %v2451_v28 }
 0x12a   :  { %v1811_v45 = vpop.eup %1810  ;;  %v1538_v55 = vsel %vm1474_vm5, %v1809_v32, 0.0  ;;  %v875_v60 = vadd.f32 %v874_v54, %v790_v3  ;;  %1812 = vrsqrt.f32 %v2548_v13  ;;  %v1259_v3 = vadd.s32 40, %v2451_v28  ;;  %vm2594_vm0 = vmand %vm1295_vm12, %vm1308_vm4 }
 0x12b   :  { %v1570_v35 = vadd.f32 %v1554_v48, %v1538_v55  ;;  %v1601_v16 = vadd.f32 %v1538_v55, %v1537_v57  ;;  %1814 = vpow2.f32 %v1509_v8  ;;  %v1102_v37 = vmul.f32 %v1101_v25, %v2483_v5 }
 0x12c   :  { %v1018_v43 = vmul.f32 2.0, %v875_v60  ;;  %v1109_v34 = vmul.f32 %v1811_v45, %v2514_v29  ;;  %v1003_v25 = vadd.f32 %v2395_v7, %v2377_v59  ;;  %v2610_v1 = vadd.s32 %v2458_v26, %v1259_v3 }
 0x12d   :  { %1586 = vst [vmem:[#allocation2] sm:$0xff] %v1570_v35  ;;  %v1104_v54 = vsel %vm1103_vm8, %v2483_v5, %v1102_v37  ;;  %v684_v57 = vpop.f32.mrf.mxu3  ;;  %v797_v24 = vpop.f32.mrf.mxu0  ;;  %vm1127_vm6 = vcmp.eq.f32.partialorder %v2548_v13, inf  ;;  %vm1129_vm7 = vcmp.eq.f32.partialorder %v2548_v13, 0.0 }
 0x12e   :  { %v1107_v50 = vsel %vm1105_vm10, %v1106_v17, %v1104_v54  ;;  %v1034_v49 = vsub.f32 %v1002_v0, %v1018_v43  ;;  %v685_v38 = vadd.f32 %v684_v57, %v576_v23  ;;  %v1110_v53 = vmul.f32 %v1811_v45, %v1109_v34  ;;  %v1393_v37 = vpop.permute.xlu0 %1392 }
 0x12f   :  { %v1492_v2 = vsub.f32 1.0, %v1107_v50  ;;  %vm1444_vm15 = vcmp.ne.f32.partialorder %v1107_v50, 0.0  ;;  %v1004_v43 = vadd.f32 %v2395_v7, %v2399_v14  ;;  %v1275_v57 = vadd.s32 %v2458_v26, %v1258_v9  ;;  %v1556_v14 = vld [vmem:[#allocation2 + $0x18] sm:$0xff] }
 0x130   :  { %v1813_v51 = vpop.eup %1812  ;;  %v2578_v5 = vmax.f32 %v1034_v49, 0.0  ;;  %v580_v58 = vpop.f32.mrf.mxu2  ;;  %v794_v19 = vadd.f32 %v793_v21, %v685_v38  ;;  %v1111_v48 = vmul.f32 0.5, %v1110_v53  ;;  %vm2605_vm1 = vmand %vm1428_vm13, %vm1444_vm15  ;;  %vm1430_vm9 = vcmp.ne.s32.totalorder %v1393_v37, %v2476_v11 }
 0x131   :  { %v882_v18 = vpop.f32.mrf.mxu1  ;;  %v1815_v30 = vpop.eup %1814  ;;  %v1511_v0 = vmul.f32 1.442695, %v1492_v2  ;;  %v1121_v22 = vmul.f32 %v1813_v51, %v2548_v13  ;;  %v581_v55 = vadd.f32 %v580_v58, %v2308_v46  ;;  %vm1476_vm5 = vmand %vm2605_vm1, %vm2594_vm0  ;;  %vm1296_vm8 = vcmp.lt.s32.totalorder %v1275_v57, 8 }
 0x132   :  { %v1539_v56 = vsel %vm1475_vm14, %v1815_v30, 0.0  ;;  %1816 = vrsqrt.f32 %v2578_v5  ;;  %v879_v60 = vadd.f32 %v878_v63, %v794_v19  ;;  %v1112_v35 = vsub.f32 1.5, %v1111_v48  ;;  %v1390_v46 = vpop.permute.xlu2 %1389  ;;  %vm2656_vm14 = vmand %vm1296_vm8, %vm1308_vm4 }
 0x133   :  { %v1571_v21 = vadd.f32 %v1555_v20, %v1539_v56  ;;  %v1602_v32 = vadd.f32 %v1601_v16, %v1539_v56  ;;  %1818 = vpow2.f32 %v1511_v0  ;;  %v1122_v8 = vmul.f32 %v1813_v51, %v1121_v22 }
 0x134   :  { %v1019_v59 = vmul.f32 2.0, %v879_v60  ;;  %v1113_v63 = vmul.f32 %v1811_v45, %v1112_v35  ;;  %v1118_v20 = vand.u32 2147483648, %v2514_v29  ;;  %v1130_v48 = vand.u32 2147483648, %v2548_v13 }
 0x135   :  { %1587 = vst [vmem:[#allocation2 + $0x58] sm:$0xff] %v1571_v21  ;;  %v1123_v17 = vmul.f32 0.5, %v1122_v8  ;;  %v690_v23 = vpop.f32.mrf.mxu3  ;;  %v2598_v16 = vpop.f32.mrf.mxu0  ;;  %v1260_v60 = vadd.s32 48, %v2451_v28  ;;  %vm1429_vm10 = vcmp.ne.s32.totalorder %v1390_v46, %v2476_v11  ;;  %vm1297_vm12 = vcmp.lt.s32.totalorder %v2610_v1, 8 }
 0x136   :  { %v691_v61 = vadd.f32 %v690_v23, %v581_v55  ;;  %v1035_v12 = vsub.f32 %v1003_v25, %v1019_v59  ;;  %v1114_v50 = vmul.f32 %v1113_v63, %v2514_v29  ;;  %vm1139_vm15 = vcmp.eq.f32.partialorder %v2578_v5, inf  ;;  %vm2673_vm1 = vmand %vm1297_vm12, %vm1308_vm4 }
 0x137   :  { %v1124_v54 = vsub.f32 1.5, %v1123_v17  ;;  %v1142_v1 = vand.u32 2147483648, %v2578_v5 }
 0x138   :  { %v1817_v34 = vpop.eup %1816  ;;  %v585_v49 = vpop.f32.mrf.mxu2  ;;  %v798_v38 = vadd.f32 %v797_v24, %v691_v61  ;;  %v2625_v19 = vmax.f32 %v1035_v12, 0.0  ;;  %v1116_v24 = vsel %vm1115_vm2, %v2514_v29, %v1114_v50  ;;  %vm1141_vm2 = vcmp.eq.f32.partialorder %v2578_v5, 0.0 }
 0x139   :  { %v2616_v39 = vpop.f32.mrf.mxu1  ;;  %v1819_v45 = vpop.eup %1818  ;;  %v1125_v2 = vmul.f32 %v1813_v51, %v1124_v54  ;;  %v1133_v53 = vmul.f32 %v1817_v34, %v2578_v5  ;;  %v1119_v56 = vsel %vm1117_vm3, %v1118_v20, %v1116_v24  ;;  %v586_v29 = vadd.f32 %v585_v49, %v2320_v31 }
 0x13a   :  { %v1540_v58 = vsel %vm1476_vm5, %v1819_v45, 0.0  ;;  %v883_v30 = vadd.f32 %v882_v18, %v798_v38  ;;  %1820 = vrsqrt.f32 %v2625_v19  ;;  %vm1445_vm11 = vcmp.ne.f32.partialorder %v1119_v56, 0.0 }
 0x13b   :  { %v1572_v0 = vadd.f32 %v1556_v14, %v1540_v58  ;;  %v2630_v22 = vadd.f32 %v1602_v32, %v1540_v58  ;;  %v1126_v9 = vmul.f32 %v1125_v2, %v2548_v13  ;;  %v1134_v51 = vmul.f32 %v1817_v34, %v1133_v53  ;;  %vm2666_vm0 = vmand %vm1429_vm10, %vm1445_vm11  ;;  %v1559_v2 = vld [vmem:[#allocation2 + $0x8] sm:$0xff] }
 0x13c   :  { %v1020_v3 = vmul.f32 2.0, %v883_v30  ;;  %v1493_v32 = vsub.f32 1.0, %v1119_v56  ;;  %v1005_v24 = vadd.f32 %v2395_v7, %v2412_v41  ;;  %vm1151_vm11 = vcmp.eq.f32.partialorder %v2625_v19, inf }
 0x13d   :  { %1588 = vst [vmem:[#allocation2 + $0x18] sm:$0xff] %v1572_v0  ;;  %v1128_v21 = vsel %vm1127_vm6, %v2548_v13, %v1126_v9  ;;  %v1135_v18 = vmul.f32 0.5, %v1134_v51  ;;  %v696_v8 = vpop.f32.mrf.mxu3  ;;  %v805_v25 = vpop.f32.mrf.mxu0  ;;  %v1557_v0 = vld [vmem:[#allocation2 + $0x50] sm:$0xff]  ;;  %vm1477_vm6 = vmand %vm2666_vm0, %vm2656_vm14 }
 0x13e   :  { %v1131_v55 = vsel %vm1129_vm7, %v1130_v48, %v1128_v21  ;;  %v1036_v35 = vsub.f32 %v1004_v43, %v1020_v3  ;;  %v1513_v59 = vmul.f32 1.442695, %v1493_v32  ;;  %v697_v63 = vadd.f32 %v696_v8, %v586_v29  ;;  %v1558_v3 = vld [vmem:[#allocation2 + $0x68] sm:$0xff] }
 0x13f   :  { %v1494_v17 = vsub.f32 1.0, %v1131_v55  ;;  %v1136_v23 = vsub.f32 1.5, %v1135_v18  ;;  %vm1446_vm13 = vcmp.ne.f32.partialorder %v1131_v55, 0.0  ;;  %v1277_v43 = vadd.s32 %v2458_v26, %v1260_v60 }
 0x140   :  { %v2645_v13 = vmax.f32 %v1036_v35, 0.0  ;;  %v590_v61 = vpop.f32.mrf.mxu2  ;;  %1822 = vpow2.f32 %v1513_v59  ;;  %v1821_v31 = vpop.eup %1820  ;;  %v802_v38 = vadd.f32 %v2598_v16, %v697_v63  ;;  %vm2685_vm3 = vmand %vm1430_vm9, %vm1446_vm13  ;;  %v1261_v18 = vadd.s32 56, %v2451_v28 }
 0x141   :  { %v2647_v54 = vpop.f32.mrf.mxu1  ;;  %v1515_v14 = vmul.f32 1.442695, %v1494_v17  ;;  %v1137_v12 = vmul.f32 %v1817_v34, %v1136_v23  ;;  %v1145_v34 = vmul.f32 %v1821_v31, %v2625_v19  ;;  %v591_v57 = vadd.f32 %v590_v61, %v2332_v42  ;;  %vm1478_vm8 = vmand %vm2685_vm3, %vm2673_vm1 }
 0x142   :  { %1824 = vrsqrt.f32 %v2645_v13  ;;  %v887_v20 = vadd.f32 %v2616_v39, %v802_v38  ;;  %vm1298_vm5 = vcmp.lt.s32.totalorder %v1277_v43, 8  ;;  %vm1153_vm13 = vcmp.eq.f32.partialorder %v2625_v19, 0.0 }
 0x143   :  { %1826 = vpow2.f32 %v1515_v14  ;;  %v1138_v50 = vmul.f32 %v1137_v12, %v2578_v5  ;;  %v1146_v53 = vmul.f32 %v1821_v31, %v1145_v34  ;;  %vm2709_vm10 = vmand %vm1298_vm5, %vm1308_vm4  ;;  %vm1163_vm1 = vcmp.eq.f32.partialorder %v2645_v13, inf }
 0x144   :  { %v1021_v41 = vmul.f32 2.0, %v887_v20  ;;  %vm1165_vm3 = vcmp.eq.f32.partialorder %v2645_v13, 0.0 }
 0x145   :  { %v1140_v16 = vsel %vm1139_vm15, %v2578_v5, %v1138_v50  ;;  %v702_v58 = vpop.f32.mrf.mxu3  ;;  %v1396_v5 = vpop.permute.xlu1 %1395  ;;  %v1147_v7 = vmul.f32 0.5, %v1146_v53 }
 0x146   :  { %v1143_v30 = vsel %vm1141_vm2, %v1142_v1, %v1140_v16  ;;  %v703_v9 = vadd.f32 %v702_v58, %v591_v57  ;;  %v1823_v51 = vpop.eup %1822  ;;  %v809_v39 = vpop.f32.mrf.mxu0  ;;  %vm1431_vm7 = vcmp.ne.s32.totalorder %v1396_v5, %v2476_v11  ;;  %v1037_v59 = vsub.f32 %v1005_v24, %v1021_v41 }
 0x147   :  { %v1495_v48 = vsub.f32 1.0, %v1143_v30  ;;  %v1541_v21 = vsel %vm1477_vm6, %v1823_v51, 0.0  ;;  %v1148_v37 = vsub.f32 1.5, %v1147_v7  ;;  %vm1447_vm9 = vcmp.ne.f32.partialorder %v1143_v30, 0.0  ;;  %v1402_v16 = vpop.permute.xlu0 %1401 }
 0x148   :  { %v1825_v56 = vpop.eup %1824  ;;  %v595_v32 = vpop.f32.mrf.mxu2  ;;  %v806_v8 = vadd.f32 %v805_v25, %v703_v9  ;;  %v1573_v29 = vadd.f32 %v1557_v0, %v1541_v21  ;;  %v1604_v35 = vadd.f32 %v2630_v22, %v1541_v21  ;;  %v2703_v12 = vmax.f32 %v1037_v59, 0.0  ;;  %vm2718_vm12 = vmand %vm1431_vm7, %vm1447_vm9  ;;  %v1560_v22 = vld [vmem:[#allocation2 + $0x48] sm:$0xff] }
 0x149   :  { %v1827_v55 = vpop.eup %1826  ;;  %v1517_v60 = vmul.f32 1.442695, %v1495_v48  ;;  %v894_v17 = vpop.f32.mrf.mxu1  ;;  %v1157_v46 = vmul.f32 %v1825_v56, %v2645_v13  ;;  %v1149_v61 = vmul.f32 %v1821_v31, %v1148_v37  ;;  %v596_v43 = vadd.f32 %v595_v32, %v2344_v62  ;;  %vm1479_vm14 = vmand %vm2718_vm12, %vm2709_vm10 }
 0x14a   :  { %v1542_v23 = vsel %vm1478_vm8, %v1827_v55, 0.0  ;;  %1589 = vst [vmem:[#allocation2 + $0x50] sm:$0xff] %v1573_v29  ;;  %v891_v50 = vadd.f32 %v2647_v54, %v806_v8  ;;  %v1154_v54 = vand.u32 2147483648, %v2625_v19  ;;  %v1278_v1 = vadd.s32 %v2458_v26, %v1261_v18  ;;  %v1399_v55 = vpop.permute.xlu2 %1398 }
 0x14b   :  { %v1574_v63 = vadd.f32 %v1558_v3, %v1542_v23  ;;  %1828 = vpow2.f32 %v1517_v60  ;;  %v2701_v25 = vadd.f32 %v1604_v35, %v1542_v23  ;;  %v1158_v14 = vmul.f32 %v1825_v56, %v1157_v46 }
 0x14c   :  { %v1150_v49 = vmul.f32 %v1149_v61, %v2625_v19  ;;  %1830 = vrsqrt.f32 %v2703_v12  ;;  %v1022_v57 = vmul.f32 2.0, %v891_v50  ;;  %vm1433_vm15 = vcmp.ne.s32.totalorder %v1402_v16, %v2476_v11 }
 0x14d   :  { %1590 = vst [vmem:[#allocation2 + $0x68] sm:$0xff] %v1574_v63  ;;  %v708_v34 = vpop.f32.mrf.mxu3  ;;  %v1159_v38 = vmul.f32 0.5, %v1158_v14  ;;  %v1262_v9 = vadd.s32 64, %v2451_v28  ;;  %vm1299_vm0 = vcmp.lt.s32.totalorder %v1278_v1, 8  ;;  %vm1432_vm6 = vcmp.ne.s32.totalorder %v1399_v55, %v2476_v11 }
 0x14e   :  { %v1152_v45 = vsel %vm1151_vm11, %v2625_v19, %v1150_v49  ;;  %v709_v58 = vadd.f32 %v708_v34, %v596_v43  ;;  %v1038_v30 = vsub.f32 %v2405_v6, %v1022_v57  ;;  %v813_v0 = vpop.f32.mrf.mxu0  ;;  %v1166_v6 = vand.u32 2147483648, %v2645_v13  ;;  %vm2751_vm5 = vmand %vm1299_vm0, %vm1308_vm4 }
 0x14f   :  { %v1155_v53 = vsel %vm1153_vm13, %v1154_v54, %v1152_v45  ;;  %v1160_v20 = vsub.f32 1.5, %v1159_v38  ;;  %v1279_v23 = vadd.s32 %v2458_v26, %v1262_v9  ;;  %v1263_v45 = vadd.s32 72, %v2451_v28 }
 0x150   :  { %v600_v24 = vpop.f32.mrf.mxu2  ;;  %v1496_v62 = vsub.f32 1.0, %v1155_v53  ;;  %v810_v5 = vadd.f32 %v809_v39, %v709_v58  ;;  %v2738_v41 = vmax.f32 %v1038_v30, 0.0  ;;  %vm1448_vm2 = vcmp.ne.f32.partialorder %v1155_v53, 0.0 }
 0x151   :  { %v1829_v42 = vpop.eup %1828  ;;  %v1161_v51 = vmul.f32 %v1825_v56, %v1160_v20  ;;  %v898_v3 = vpop.f32.mrf.mxu1  ;;  %v601_v56 = vadd.f32 %v600_v24, %v2358_v27  ;;  %vm2758_vm8 = vmand %vm1432_vm6, %vm1448_vm2  ;;  %vm1300_vm11 = vcmp.lt.s32.totalorder %v1279_v23, 8  ;;  %v1264_v23 = vadd.s32 80, %v2451_v28 }
 0x152   :  { %v2734_v19 = vsel %vm1479_vm14, %v1829_v42, 0.0  ;;  %v1519_v7 = vmul.f32 1.442695, %v1496_v62  ;;  %v1831_v21 = vpop.eup %1830  ;;  %v895_v32 = vadd.f32 %v894_v17, %v810_v5  ;;  %vm1480_vm10 = vmand %vm2758_vm8, %vm2751_vm5  ;;  %v1405_v24 = vpop.permute.xlu1 %1404  ;;  %vm1175_vm14 = vcmp.eq.f32.partialorder %v2703_v12, inf }
 0x153   :  { %v1575_v48 = vadd.f32 %v1559_v2, %v2734_v19  ;;  %v1162_v18 = vmul.f32 %v1161_v51, %v2645_v13  ;;  %v1169_v39 = vmul.f32 %v1831_v21, %v2703_v12  ;;  %vm1434_vm12 = vcmp.ne.s32.totalorder %v1405_v24, %v2476_v11  ;;  %vm2782_vm13 = vmand %vm1300_vm11, %vm1308_vm4  ;;  %v1408_v35 = vpop.permute.xlu2 %1407  ;;  %v1562_v24 = vld [vmem:[#allocation2 + $0x20] sm:$0xff] }
 0x154   :  { %1832 = vpow2.f32 %v1519_v7  ;;  %v1023_v29 = vmul.f32 2.0, %v895_v32  ;;  %v1178_v51 = vand.u32 2147483648, %v2703_v12  ;;  %vm1187_vm6 = vcmp.eq.f32.partialorder %v2738_v41, inf }
 0x155   :  { %1591 = vst [vmem:[#allocation2 + $0x8] sm:$0xff] %v1575_v48  ;;  %v714_v8 = vpop.f32.mrf.mxu3  ;;  %v1164_v60 = vsel %vm1163_vm1, %v2645_v13, %v1162_v18  ;;  %1834 = vrsqrt.f32 %v2738_v41  ;;  %v1170_v27 = vmul.f32 %v1831_v21, %v1169_v39  ;;  %v1561_v48 = vld [vmem:[#allocation2 + $0x40] sm:$0xff] }
 0x156   :  { %v1167_v37 = vsel %vm1165_vm3, %v1166_v6, %v1164_v60  ;;  %v715_v17 = vadd.f32 %v714_v8, %v601_v56  ;;  %v1039_v59 = vsub.f32 %v2415_v10, %v1023_v29  ;;  %v817_v38 = vpop.f32.mrf.mxu0  ;;  %vm1435_vm3 = vcmp.ne.s32.totalorder %v1408_v35, %v2476_v11 }
 0x157   :  { %vm1449_vm7 = vcmp.ne.f32.partialorder %v1167_v37, 0.0  ;;  %v1497_v46 = vsub.f32 1.0, %v1167_v37  ;;  %v1171_v14 = vmul.f32 0.5, %v1170_v27 }
 0x158   :  { %v605_v63 = vpop.f32.mrf.mxu2  ;;  %vm2765_vm9 = vmand %vm1433_vm15, %vm1449_vm7  ;;  %v814_v50 = vadd.f32 %v813_v0, %v715_v17  ;;  %v2769_v34 = vmax.f32 %v1039_v59, 0.0  ;;  %vm1177_vm15 = vcmp.eq.f32.partialorder %v2703_v12, 0.0  ;;  %vm1189_vm7 = vcmp.eq.f32.partialorder %v2738_v41, 0.0 }
 0x159   :  { %v1521_v49 = vmul.f32 1.442695, %v1497_v46  ;;  %v1172_v10 = vsub.f32 1.5, %v1171_v14  ;;  %v606_v53 = vadd.f32 %v605_v63, %v2373_v33  ;;  %v902_v58 = vpop.f32.mrf.mxu1  ;;  %v1606_v33 = vadd.f32 %v2701_v25, %v2734_v19  ;;  %vm1481_vm0 = vmand %vm2765_vm9, %vm2782_vm13 }
 0x15a   :  { %v1833_v31 = vpop.eup %1832  ;;  %v899_v54 = vadd.f32 %v898_v3, %v814_v50  ;;  %v1280_v3 = vadd.s32 %v2458_v26, %v1263_v45  ;;  %vm1199_vm13 = vcmp.eq.f32.partialorder %v2769_v34, inf }
 0x15b   :  { %v1835_v43 = vpop.eup %1834  ;;  %1836 = vpow2.f32 %v1521_v49  ;;  %v1544_v1 = vsel %vm1480_vm10, %v1833_v31, 0.0  ;;  %v1173_v2 = vmul.f32 %v1831_v21, %v1172_v10 }
 0x15c   :  { %v1576_v57 = vadd.f32 %v1560_v22, %v1544_v1  ;;  %v1181_v16 = vmul.f32 %v1835_v43, %v2738_v41  ;;  %1838 = vrsqrt.f32 %v2769_v34  ;;  %v1024_v42 = vmul.f32 2.0, %v899_v54 }
 0x15d   :  { %v720_v20 = vpop.f32.mrf.mxu3  ;;  %v1174_v30 = vmul.f32 %v1173_v2, %v2703_v12  ;;  %v1607_v25 = vadd.f32 %v1606_v33, %v1544_v1  ;;  %vm1301_vm5 = vcmp.lt.s32.totalorder %v1280_v3, 8  ;;  %v1281_v54 = vadd.s32 %v2458_v26, %v1264_v23 }
 0x15e   :  { %1592 = vst [vmem:[#allocation2 + $0x48] sm:$0xff] %v1576_v57  ;;  %v1182_v0 = vmul.f32 %v1835_v43, %v1181_v16  ;;  %v721_v9 = vadd.f32 %v720_v20, %v606_v53  ;;  %v1040_v5 = vsub.f32 %v2423_v36, %v1024_v42  ;;  %v821_v59 = vpop.f32.mrf.mxu0  ;;  %vm2820_vm8 = vmand %vm1301_vm5, %vm1308_vm4  ;;  %v1265_v57 = vadd.s32 88, %v2451_v28 }
 0x15f   :  { %v1176_v7 = vsel %vm1175_vm14, %v2703_v12, %v1174_v30  ;;  %vm1201_vm14 = vcmp.eq.f32.partialorder %v2769_v34, 0.0 }
 0x160   :  { %v1183_v21 = vmul.f32 0.5, %v1182_v0  ;;  %v610_v18 = vpop.f32.mrf.mxu2  ;;  %v1179_v19 = vsel %vm1177_vm15, %v1178_v51, %v1176_v7  ;;  %v2799_v32 = vmax.f32 %v1040_v5, 0.0  ;;  %v818_v36 = vadd.f32 %v817_v38, %v721_v9 }
 0x161   :  { %v1837_v6 = vpop.eup %1836  ;;  %vm1450_vm1 = vcmp.ne.f32.partialorder %v1179_v19, 0.0  ;;  %v1498_v56 = vsub.f32 1.0, %v1179_v19  ;;  %v611_v37 = vadd.f32 %v610_v18, %v2388_v52  ;;  %v906_v22 = vpop.f32.mrf.mxu1  ;;  %v1190_v52 = vand.u32 2147483648, %v2738_v41 }
 0x162   :  { %v1545_v39 = vsel %vm1481_vm0, %v1837_v6, 0.0  ;;  %v1184_v8 = vsub.f32 1.5, %v1183_v21  ;;  %v1839_v12 = vpop.eup %1838  ;;  %vm2803_vm2 = vmand %vm1434_vm12, %vm1450_vm1  ;;  %1840 = vrsqrt.f32 %v2799_v32  ;;  %v903_v63 = vadd.f32 %v902_v58, %v818_v36 }
 0x163   :  { %v1577_v55 = vadd.f32 %v1561_v48, %v1545_v39  ;;  %v1608_v60 = vadd.f32 %v1607_v25, %v1545_v39  ;;  %v1523_v27 = vmul.f32 1.442695, %v1498_v56  ;;  %v1193_v13 = vmul.f32 %v1839_v12, %v2769_v34  ;;  %vm1482_vm11 = vmand %vm2803_vm2, %vm2820_vm8  ;;  %v1411_v56 = vpop.permute.xlu0 %1410 }
 0x164   :  { %v1185_v17 = vmul.f32 %v1835_v43, %v1184_v8  ;;  %v1025_v49 = vmul.f32 2.0, %v903_v63  ;;  %vm1302_vm12 = vcmp.lt.s32.totalorder %v1281_v54, 8  ;;  %v1282_v5 = vadd.s32 %v2458_v26, %v1265_v57  ;;  %v1414_v54 = vpop.permute.xlu1 %1413 }
 0x165   :  { %v726_v46 = vpop.f32.mrf.mxu3  ;;  %1593 = vst [vmem:[#allocation2 + $0x40] sm:$0xff] %v1577_v55  ;;  %1842 = vpow2.f32 %v1523_v27  ;;  %v1194_v50 = vmul.f32 %v1839_v12, %v1193_v13  ;;  %v1202_v6 = vand.u32 2147483648, %v2769_v34  ;;  %vm2851_vm15 = vmand %vm1302_vm12, %vm1308_vm4  ;;  %vm1436_vm0 = vcmp.ne.s32.totalorder %v1411_v56, %v2476_v11 }
 0x166   :  { %v727_v61 = vadd.f32 %v726_v46, %v611_v37  ;;  %v1186_v14 = vmul.f32 %v1185_v17, %v2738_v41  ;;  %v1041_v2 = vsub.f32 %v2418_v47, %v1025_v49  ;;  %v825_v36 = vpop.f32.mrf.mxu0  ;;  %v1563_v37 = vld [vmem:[#allocation2 + $0x10] sm:$0xff]  ;;  %vm1303_vm2 = vcmp.lt.s32.totalorder %v1282_v5, 8  ;;  %v1417_v5 = vpop.permute.xlu2 %1416 }
 0x167   :  { %v1195_v38 = vmul.f32 0.5, %v1194_v50  ;;  %v1266_v46 = vadd.s32 96, %v2451_v28  ;;  %v1214_v50 = vand.u32 2147483648, %v2799_v32  ;;  %vm1437_vm8 = vcmp.ne.s32.totalorder %v1414_v54, %v2476_v11 }
 0x168   :  { %v822_v31 = vadd.f32 %v821_v59, %v727_v61  ;;  %v1188_v10 = vsel %vm1187_vm6, %v2738_v41, %v1186_v14  ;;  %v1841_v43 = vpop.eup %1840  ;;  %v615_v58 = vpop.f32.mrf.mxu2  ;;  %v2833_v62 = vmax.f32 %v1041_v2, 0.0  ;;  %vm1211_vm6 = vcmp.eq.f32.partialorder %v2799_v32, inf }
 0x169   :  { %v1191_v45 = vsel %vm1189_vm7, %v1190_v52, %v1188_v10  ;;  %v1196_v20 = vsub.f32 1.5, %v1195_v38  ;;  %v1205_v41 = vmul.f32 %v1841_v43, %v2799_v32  ;;  %v616_v48 = vadd.f32 %v615_v58, %v2410_v40 }
 0x16a   :  { %v907_v16 = vadd.f32 %v906_v22, %v822_v31  ;;  %vm1451_vm9 = vcmp.ne.f32.partialorder %v1191_v45, 0.0  ;;  %v1499_v53 = vsub.f32 1.0, %v1191_v45  ;;  %1844 = vrsqrt.f32 %v2833_v62 }
 0x16b   :  { %vm2829_vm10 = vmand %vm1435_vm3, %vm1451_vm9  ;;  %v1843_v0 = vpop.eup %1842  ;;  %v1197_v9 = vmul.f32 %v1839_v12, %v1196_v20  ;;  %v1206_v33 = vmul.f32 %v1841_v43, %v1205_v41  ;;  %vm1213_vm7 = vcmp.eq.f32.partialorder %v2799_v32, 0.0  ;;  %v1564_v41 = vld [vmem:[#allocation2 + $0x38] sm:$0xff]  ;;  %v1267_v58 = vadd.s32 104, %v2451_v28 }
 0x16c   :  { %v1026_v30 = vmul.f32 2.0, %v907_v16  ;;  %v1525_v47 = vmul.f32 1.442695, %v1499_v53  ;;  %v1546_v51 = vsel %vm1482_vm11, %v1843_v0, 0.0  ;;  %vm1483_vm5 = vmand %vm2829_vm10, %vm2851_vm15  ;;  %vm1223_vm15 = vcmp.eq.f32.partialorder %v2833_v62, inf }
 0x16d   :  { %v732_v7 = vpop.f32.mrf.mxu3  ;;  %v1578_v3 = vadd.f32 %v1562_v24, %v1546_v51  ;;  %v1609_v21 = vadd.f32 %v1608_v60, %v1546_v51  ;;  %v1198_v18 = vmul.f32 %v1197_v9, %v2769_v34  ;;  %v1207_v25 = vmul.f32 0.5, %v1206_v33  ;;  %vm2879_vm9 = vmand %vm1303_vm2, %vm1308_vm4 }
 0x16e   :  { %1846 = vpow2.f32 %v1525_v47  ;;  %v1042_v19 = vsub.f32 %v2426_v15, %v1026_v30  ;;  %v733_v40 = vadd.f32 %v732_v7, %v616_v48  ;;  %v910_v15 = vpop.f32.mrf.mxu1  ;;  %v1226_v7 = vand.u32 2147483648, %v2833_v62 }
 0x16f   :  { %1594 = vst [vmem:[#allocation2 + $0x20] sm:$0xff] %v1578_v3  ;;  %v1200_v39 = vsel %vm1199_vm13, %v2769_v34, %v1198_v18  ;;  %v1208_v55 = vsub.f32 1.5, %v1207_v25  ;;  %v1284_v3 = vadd.s32 %v2458_v26, %v1267_v58  ;;  %v2910_v25 = vld [vmem:[%s1982_s3] ss:$0 sm:$0xff]  ;;  %v1269_v54 = vadd.s32 120, %v2451_v28  ;;  %v1568_v58 = vld [vmem:[#allocation2 + $0x28] sm:$0xff] }
 0x170   :  { %v1203_v12 = vsel %vm1201_vm14, %v1202_v6, %v1200_v39  ;;  %v2855_v60 = vmax.f32 %v1042_v19, 0.0  ;;  %v826_v35 = vadd.f32 %v825_v36, %v733_v40  ;;  %v1845_v34 = vpop.eup %1844  ;;  %v1565_v19 = vld [vmem:[#allocation2 + $0x60] sm:$0xff] }
 0x171   :  { %vm1452_vm1 = vcmp.ne.f32.partialorder %v1203_v12, 0.0  ;;  %v1500_v29 = vsub.f32 1.0, %v1203_v12  ;;  %v1209_v17 = vmul.f32 %v1841_v43, %v1208_v55  ;;  %v1217_v59 = vmul.f32 %v1845_v34, %v2833_v62 }
 0x172   :  { %vm2858_vm3 = vmand %vm1436_vm0, %vm1452_vm1  ;;  %1848 = vrsqrt.f32 %v2855_v60  ;;  %v911_v63 = vadd.f32 %v910_v15, %v826_v35  ;;  %v1283_v43 = vadd.s32 %v2458_v26, %v1266_v46  ;;  %vm1225_vm0 = vcmp.eq.f32.partialorder %v2833_v62, 0.0 }
 0x173   :  { %v1527_v13 = vmul.f32 1.442695, %v1500_v29  ;;  %v1210_v14 = vmul.f32 %v1209_v17, %v2799_v32  ;;  %v1218_v49 = vmul.f32 %v1845_v34, %v1217_v59  ;;  %vm1484_vm12 = vmand %vm2858_vm3, %vm2879_vm9  ;;  %vm1438_vm1 = vcmp.ne.s32.totalorder %v1417_v5, %v2910_v25 }
 0x174   :  { %v1847_v23 = vpop.eup %1846  ;;  %v1027_v10 = vmul.f32 2.0, %v911_v63  ;;  %vm1304_vm13 = vcmp.lt.s32.totalorder %v1283_v43, 8  ;;  %v1268_v15 = vadd.s32 112, %v2451_v28  ;;  %v1286_v16 = vadd.s32 %v2458_v26, %v1269_v54 }
 0x175   :  { %v1547_v61 = vsel %vm1483_vm5, %v1847_v23, 0.0  ;;  %1850 = vpow2.f32 %v1527_v13  ;;  %v1212_v31 = vsel %vm1211_vm6, %v2799_v32, %v1210_v14  ;;  %v1219_v1 = vmul.f32 0.5, %v1218_v49  ;;  %vm2899_vm14 = vmand %vm1304_vm13, %vm1308_vm4  ;;  %v1566_v14 = vld [vmem:[#allocation2 + $0x70] sm:$0xff] }
 0x176   :  { %v1579_v22 = vadd.f32 %v1563_v37, %v1547_v61  ;;  %v1610_v52 = vadd.f32 %v1609_v21, %v1547_v61  ;;  %v1215_v38 = vsel %vm1213_vm7, %v1214_v50, %v1212_v31  ;;  %v1043_v32 = vsub.f32 %v2438_v44, %v1027_v10 }
 0x177   :  { %vm1453_vm10 = vcmp.ne.f32.partialorder %v1215_v38, 0.0  ;;  %v1501_v2 = vsub.f32 1.0, %v1215_v38  ;;  %v1220_v53 = vsub.f32 1.5, %v1219_v1  ;;  %vm1305_vm5 = vcmp.lt.s32.totalorder %v1284_v3, 8  ;;  %v1423_v38 = vpop.permute.xlu1 %1422  ;;  %v1567_v1 = vld [vmem:[#allocation2 + $0x78] sm:$0xff] }
 0x178   :  { %1595 = vst [vmem:[#allocation2 + $0x10] sm:$0xff] %v1579_v22  ;;  %v1849_v45 = vpop.eup %1848  ;;  %vm2884_vm11 = vmand %vm1437_vm8, %vm1453_vm10  ;;  %v2890_v24 = vmax.f32 %v1043_v32, 0.0  ;;  %vm1235_vm7 = vcmp.eq.f32.partialorder %v2855_v60, inf  ;;  %v1238_v37 = vand.u32 2147483648, %v2855_v60  ;;  %vm1237_vm8 = vcmp.eq.f32.partialorder %v2855_v60, 0.0 }
 0x179   :  { %v1229_v20 = vmul.f32 %v1849_v45, %v2855_v60  ;;  %v1529_v11 = vmul.f32 1.442695, %v1501_v2  ;;  %v1221_v44 = vmul.f32 %v1845_v34, %v1220_v53  ;;  %vm1485_vm2 = vmand %vm2884_vm11, %vm2899_vm14  ;;  %v1285_v13 = vadd.s32 %v2458_v26, %v1268_v15 }
 0x17a   :  { %vm1356_vm10 = vmand %vm1305_vm5, %vm1308_vm4 }
 0x17b   :  { %v1851_v42 = vpop.eup %1850  ;;  %v1230_v30 = vmul.f32 %v1849_v45, %v1229_v20  ;;  %1852 = vpow2.f32 %v1529_v11  ;;  %v1222_v33 = vmul.f32 %v1221_v44, %v2833_v62  ;;  %vm1306_vm14 = vcmp.lt.s32.totalorder %v1285_v13, 8 }
 0x17c   :  { %v1548_v0 = vsel %vm1484_vm12, %v1851_v42, 0.0  ;;  %1854 = vrsqrt.f32 %v2890_v24 }
 0x17d   :  { %v1580_v47 = vadd.f32 %v1564_v41, %v1548_v0  ;;  %v1611_v9 = vadd.f32 %v1610_v52, %v1548_v0  ;;  %v1231_v51 = vmul.f32 0.5, %v1230_v30  ;;  %v1224_v21 = vsel %vm1223_vm15, %v2833_v62, %v1222_v33  ;;  %v1420_v62 = vpop.permute.xlu0 %1419  ;;  %vm1357_vm15 = vmand %vm1306_vm14, %vm1308_vm4 }
 0x17e   :  { %v1227_v6 = vsel %vm1225_vm0, %v1226_v7, %v1224_v21  ;;  %vm1439_vm9 = vcmp.ne.s32.totalorder %v1420_v62, %v2910_v25  ;;  %vm1247_vm0 = vcmp.eq.f32.partialorder %v2890_v24, inf }
 0x17f   :  { %1596 = vst [vmem:[#allocation2 + $0x38] sm:$0xff] %v1580_v47  ;;  %v1232_v18 = vsub.f32 1.5, %v1231_v51  ;;  %vm1454_vm3 = vcmp.ne.f32.partialorder %v1227_v6, 0.0  ;;  %v1502_v36 = vsub.f32 1.0, %v1227_v6 }
 0x180   :  { %vm2917_vm6 = vmand %vm1438_vm1, %vm1454_vm3  ;;  %vm1440_vm3 = vcmp.ne.s32.totalorder %v1423_v38, %v2910_v25 }
 0x181   :  { %v1233_v39 = vmul.f32 %v1849_v45, %v1232_v18  ;;  %v1853_v40 = vpop.eup %1852  ;;  %v1531_v12 = vmul.f32 1.442695, %v1502_v36  ;;  %vm1486_vm13 = vmand %vm2917_vm6, %vm1356_vm10  ;;  %v1250_v45 = vand.u32 2147483648, %v2890_v24 }
 0x182   :  { %v1549_v8 = vsel %vm1485_vm2, %v1853_v40, 0.0  ;;  %v1855_v29 = vpop.eup %1854  ;;  %vm1249_vm2 = vcmp.eq.f32.partialorder %v2890_v24, 0.0 }
 0x183   :  { %v1234_v55 = vmul.f32 %v1233_v39, %v2855_v60  ;;  %v1581_v35 = vadd.f32 %v1565_v19, %v1549_v8  ;;  %v1612_v34 = vadd.f32 %v1611_v9, %v1549_v8  ;;  %1856 = vpow2.f32 %v1531_v12 }
 0x184   :  { %v1241_v17 = vmul.f32 %v1855_v29, %v2890_v24  ;;  %v1624_v9 = vstv %s1623_s28 }
 0x185   :  { %v1236_v27 = vsel %vm1235_vm7, %v2855_v60, %v1234_v55  ;;  %1597 = vst [vmem:[#allocation2 + $0x60] sm:$0xff] %v1581_v35  ;;  %vm1307_vm7 = vcmp.lt.s32.totalorder %v1286_v16, 8 }
 0x186   :  { %v1239_v23 = vsel %vm1237_vm8, %v1238_v37, %v1236_v27  ;;  %v1242_v59 = vmul.f32 %v1855_v29, %v1241_v17  ;;  %vm1358_vm8 = vmand %vm1307_vm7, %vm1308_vm4  ;;  %vm1625_vm4 = vcmp.eq.s32.totalorder %v1624_v9, 1 }
 0x187   :  { %vm1455_vm11 = vcmp.ne.f32.partialorder %v1239_v23, 0.0  ;;  %v1503_v46 = vsub.f32 1.0, %v1239_v23 }
 0x188   :  { %vm2933_vm12 = vmand %vm1439_vm9, %vm1455_vm11  ;;  %v1243_v61 = vmul.f32 0.5, %v1242_v59 }
 0x189   :  { %v1533_v60 = vmul.f32 1.442695, %v1503_v46  ;;  %v1857_v50 = vpop.eup %1856  ;;  %vm1487_vm1 = vmand %vm2933_vm12, %vm1357_vm15 }
 0x18a   :  { %v1244_v22 = vsub.f32 1.5, %v1243_v61  ;;  %v1550_v52 = vsel %vm1486_vm13, %v1857_v50, 0.0 }
 0x18b   :  { %1858 = vpow2.f32 %v1533_v60  ;;  %v1582_v49 = vadd.f32 %v1566_v14, %v1550_v52  ;;  %v1613_v31 = vadd.f32 %v1612_v34, %v1550_v52 }
 0x18c   :  { %v1245_v10 = vmul.f32 %v1855_v29, %v1244_v22 }
 0x18d   :  { %1598 = vst [vmem:[#allocation2 + $0x70] sm:$0xff] %v1582_v49 }
 0x18e   :  { %v1246_v43 = vmul.f32 %v1245_v10, %v2890_v24 }
 0x190   :  { %v1248_v2 = vsel %vm1247_vm0, %v2890_v24, %v1246_v43 }
 0x191   :  { %v1859_v57 = vpop.eup %1858  ;;  %v1251_v32 = vsel %vm1249_vm2, %v1250_v45, %v1248_v2 }
 0x192   :  { %v1551_v28 = vsel %vm1487_vm1, %v1859_v57, 0.0  ;;  %vm1456_vm5 = vcmp.ne.f32.partialorder %v1251_v32, 0.0  ;;  %v1504_v41 = vsub.f32 1.0, %v1251_v32 }
 0x193   :  { %v1583_v53 = vadd.f32 %v1567_v1, %v1551_v28  ;;  %v1614_v20 = vadd.f32 %v1613_v31, %v1551_v28  ;;  %vm1472_vm6 = vmand %vm1440_vm3, %vm1456_vm5 }
 0x194   :  { %v1535_v11 = vmul.f32 1.442695, %v1504_v41  ;;  %vm1488_vm9 = vmand %vm1472_vm6, %vm1358_vm8 }
 0x195   :  { %1599 = vst [vmem:[#allocation2 + $0x78] sm:$0xff] %v1583_v53 }
 0x196   :  { %1860 = vpow2.f32 %v1535_v11 }
 0x19c   :  { %v1861_v24 = vpop.eup %1860 }
 0x19d   :  { %v1552_v42 = vsel %vm1488_vm9, %v1861_v24, 0.0 }
 0x19e   :  { %v1584_v44 = vadd.f32 %v1568_v58, %v1552_v42  ;;  %v1615_v30 = vadd.f32 %v1614_v20, %v1552_v42 }
 0x1a0   :  { %1600 = vst [vmem:[#allocation2 + $0x28] sm:$0xff] %v1584_v44  ;;  %v1616_v26 = vrot.slane %v1615_v30, 4 }
 0x1a2   :  { %v1617_v0 = vadd.f32 %v1616_v26, %v1615_v30 }
 0x1a4   :  { %v1618_v47 = vrot.slane %v1617_v0, 2 }
 0x1a6   :  { %v1619_v4 = vadd.f32 %v1618_v47, %v1617_v0 }
 0x1a8   :  { %v1620_v33 = vrot.slane %v1619_v4, 1 }
 0x1a9   :  { %1631 = sbr.rel (%p1781_p4) target bundleno = 588 (0x24c), region = 33 }
 0x1aa   :  { %v1621_v51 = vadd.f32 %v1620_v33, %v1619_v4 }
 0x1ac   :  { %v1626_v5 = vsel %vm1625_vm4, 0.0, %v1621_v51 }
 0x1ad   :  { %1627 = vst [vmem:[#allocation6] sm:$0x1] %v1626_v5 }
 0x1ae   :  { %v1632_v48 = vld [vmem:[#allocation2 + $0x30] sm:$0xff]  ;;  %v1634_v3 = vld [vmem:[#allocation2 + $0x58] sm:$0xff]  ;;  %v1633_v21 = vld [vmem:[#allocation2] sm:$0xff]  ;;  %vm1680_vm10 = vcmask 7168  }
 0x1af   :  { %v1636_v7 = vld [vmem:[#allocation2 + $0x50] sm:$0xff]  ;;  %1648 = vadd.xlane.f32.xlu0 %v1632_v48  ;;  %1652 = vadd.xlane.f32.xlu1 %v1634_v3  ;;  %v1637_v18 = vld [vmem:[#allocation2 + $0x68] sm:$0xff]  ;;  %v1635_v6 = vld [vmem:[#allocation2 + $0x18] sm:$0xff] }
 0x1b0   :  { %1656 = vadd.xlane.f32.xlu2 %v1636_v7  ;;  %v1638_v25 = vld [vmem:[#allocation2 + $0x8] sm:$0xff]  ;;  %v1640_v19 = vld [vmem:[#allocation2 + $0x40] sm:$0xff]  ;;  %v1643_v40 = vld [vmem:[#allocation2 + $0x38] sm:$0xff] }
 0x1b1   :  { %v1639_v36 = vld [vmem:[#allocation2 + $0x48] sm:$0xff]  ;;  %v1641_v39 = vld [vmem:[#allocation2 + $0x20] sm:$0xff]  ;;  %v1642_v56 = vld [vmem:[#allocation2 + $0x10] sm:$0xff] }
 0x1b2   :  { %v1644_v62 = vld [vmem:[#allocation2 + $0x60] sm:$0xff]  ;;  %v1646_v8 = vld [vmem:[#allocation2 + $0x78] sm:$0xff]  ;;  %v1645_v12 = vld [vmem:[#allocation2 + $0x70] sm:$0xff] }
 0x1b3   :  { %v1647_v55 = vld [vmem:[#allocation2 + $0x28] sm:$0xff] }
 0x1b7   :  { %1650 = vadd.xlane.f32.xlu0 %v1633_v21  ;;  %1654 = vadd.xlane.f32.xlu1 %v1635_v6 }
 0x1b8   :  { %1658 = vadd.xlane.f32.xlu2 %v1637_v18 }
 0x1bf   :  { %1660 = vadd.xlane.f32.xlu0 %v1638_v25  ;;  %1662 = vadd.xlane.f32.xlu1 %v1639_v36 }
 0x1c0   :  { %1664 = vadd.xlane.f32.xlu2 %v1640_v19 }
 0x1c7   :  { %1666 = vadd.xlane.f32.xlu0 %v1641_v39  ;;  %1668 = vadd.xlane.f32.xlu1 %v1642_v56 }
 0x1c8   :  { %1670 = vadd.xlane.f32.xlu2 %v1643_v40 }
 0x1cf   :  { %1672 = vadd.xlane.f32.xlu0 %v1644_v62  ;;  %1674 = vadd.xlane.f32.xlu1 %v1645_v12 }
 0x1d0   :  { %1676 = vadd.xlane.f32.xlu2 %v1646_v8 }
 0x1d7   :  { %1678 = vadd.xlane.f32.xlu0 %v1647_v55 }
 0x222   :  { %v1649_v15 = vpop.xlane.xlu0 %1648  ;;  %v1653_v35 = vpop.xlane.xlu1 %1652 }
 0x223   :  { %v1657_v29 = vpop.xlane.xlu2 %1656  ;;  %1681 = vst.msk [vmem:[%s1987_s2] sm:$0xff] %vm1680_vm10, %v1649_v15 }
 0x224   :  { %1685 = vst.msk [vmem:[%s1987_s2 + $0x20] sm:$0xff] %vm1680_vm10, %v1657_v29 }
 0x225   :  { %1683 = vst.msk [vmem:[%s1987_s2 + $0x10] sm:$0xff] %vm1680_vm10, %v1653_v35 }
 0x22a   :  { %v1651_v34 = vpop.xlane.xlu0 %1650  ;;  %v1655_v27 = vpop.xlane.xlu1 %1654 }
 0x22b   :  { %v1659_v37 = vpop.xlane.xlu2 %1658  ;;  %1682 = vst.msk [vmem:[%s1987_s2 + $0x8] sm:$0xff] %vm1680_vm10, %v1651_v34 }
 0x22c   :  { %1686 = vst.msk [vmem:[%s1987_s2 + $0x28] sm:$0xff] %vm1680_vm10, %v1659_v37 }
 0x22d   :  { %1684 = vst.msk [vmem:[%s1987_s2 + $0x18] sm:$0xff] %vm1680_vm10, %v1655_v27 }
 0x232   :  { %v1661_v17 = vpop.xlane.xlu0 %1660  ;;  %v1663_v13 = vpop.xlane.xlu1 %1662 }
 0x233   :  { %v1665_v23 = vpop.xlane.xlu2 %1664  ;;  %1687 = vst.msk [vmem:[%s1987_s2 + $0x30] sm:$0xff] %vm1680_vm10, %v1661_v17 }
 0x234   :  { %1689 = vst.msk [vmem:[%s1987_s2 + $0x40] sm:$0xff] %vm1680_vm10, %v1665_v23 }
 0x235   :  { %1688 = vst.msk [vmem:[%s1987_s2 + $0x38] sm:$0xff] %vm1680_vm10, %v1663_v13 }
 0x23a   :  { %v1667_v46 = vpop.xlane.xlu0 %1666  ;;  %v1669_v63 = vpop.xlane.xlu1 %1668 }
 0x23b   :  { %v1671_v59 = vpop.xlane.xlu2 %1670  ;;  %1690 = vst.msk [vmem:[%s1987_s2 + $0x48] sm:$0xff] %vm1680_vm10, %v1667_v46 }
 0x23c   :  { %1692 = vst.msk [vmem:[%s1987_s2 + $0x58] sm:$0xff] %vm1680_vm10, %v1671_v59 }
 0x23d   :  { %1691 = vst.msk [vmem:[%s1987_s2 + $0x50] sm:$0xff] %vm1680_vm10, %v1669_v63 }
 0x242   :  { %v1673_v60 = vpop.xlane.xlu0 %1672  ;;  %v1675_v14 = vpop.xlane.xlu1 %1674 }
 0x243   :  { %v1677_v61 = vpop.xlane.xlu2 %1676  ;;  %1693 = vst.msk [vmem:[%s1987_s2 + $0x60] sm:$0xff] %vm1680_vm10, %v1673_v60 }
 0x244   :  { %1695 = vst.msk [vmem:[%s1987_s2 + $0x70] sm:$0xff] %vm1680_vm10, %v1677_v61 }
 0x245   :  { %1694 = vst.msk [vmem:[%s1987_s2 + $0x68] sm:$0xff] %vm1680_vm10, %v1675_v14 }
 0x24a   :  { %v1679_v50 = vpop.xlane.xlu0 %1678 }
 0x24b   :  { %1696 = vst.msk [vmem:[%s1987_s2 + $0x78] sm:$0xff] %vm1680_vm10, %v1679_v50 }
 0x24c PF:  { %s1714_s10 = sshll.u32 %s3006_s9, 4  ;;  %s1891_s12 = smov [#allocation6]   ;;  %s1715_s10 = int_to_ptr.hbm [resolvable:$true] %s1714_s10 }
 0x24d   :  { %s1712_s13 = sshll.u32 %s1891_s12, 4  ;;  %s1713_s13 = int_to_ptr.vmem [resolvable:$true] %s1712_s13 }
 0x24e   :  { %1717 = dma.vmem_to_hbm [thread:$0]  %s1713_s13, 16, %s1715_s10, [#allocation7]  }
 0x24f   :  { %1887 = dma.done.wait [#allocation7], 16  }
 0x250   :  { %1888 = vsyncadd [#allocation7], 4294967280 }
 0x251   :  { %1730 = vsyncpa [#allocation7], 1 }

</bundles_post_ra>
